<compile_context>
chip_gen: v5e
topology: v5e:2x2
jax: 0.10.0
libtpu: 0.0.40
codegen_flags: <defaults>
</compile_context>

<pallas_src>
import functools
import math

import jax
import jax.numpy as jnp
from jax.experimental import pallas as pl
from jax.experimental.pallas import tpu as pltpu


# ----------------------------------------------------------------------------
# Fused Pallas kernel: whole HDVAE forward
# ----------------------------------------------------------------------------
def _hdvae_kernel(
    # --- inputs ---
    q_ref, eps_ref,
    aw1_ref, ab1_ref, aw2_ref, ab2_ref,                    # AdjointNet
    hw1_ref, hb1_ref, hv_ref, hwf_ref,                     # HNet (+ folded HDNet field weight)
    dw1_ref, db1_ref, dv_ref, dwf_ref,                     # HnetDecoder (+ folded inverse field weight)
    ew1_ref, eb1_ref, ew2m_ref, eb2m_ref, ew2l_ref, eb2l_ref,  # z_encoder (mu / logvar heads)
    zw1_ref, zb1_ref, zw2_ref, zb2_ref,                    # z_decoder
    # --- outputs ---
    qp_ref, qp_hat_ref, qpt_ref, qpt_hat_ref, mu_ref, logvar_ref,
    *, T, num_steps):
    f32 = jnp.float32
    bf16 = jnp.bfloat16
    bb = q_ref.shape[0]

    def mm(x, w_bf16):
        # bf16 operands, f32 accumulation on the MXU.
        return jnp.dot(x.astype(bf16), w_bf16, preferred_element_type=f32)

    # ---- AdjointNet: p = tanh(q W1 + b1) W2 + b2 ---------------------------
    q = q_ref[...]
    ah = jnp.tanh(mm(q, aw1_ref[...].astype(bf16)) + ab1_ref[...])
    p = mm(ah, aw2_ref[...].astype(bf16)) + ab2_ref[...]
    qp = jnp.concatenate([q, p], axis=1)
    qp_ref[...] = qp

    dt = T / num_steps

    def make_field(w1_ref, b1_ref, v_ref, wf_ref):
        # Hoist ref loads, bf16 casts, and sublane broadcasts out of the loop.
        w1 = w1_ref[...].astype(bf16)
        wf = wf_ref[...].astype(bf16)
        b1 = jnp.broadcast_to(b1_ref[...], (bb, b1_ref.shape[1]))
        v = jnp.broadcast_to(v_ref[...], (bb, v_ref.shape[1]))

        def field(x):
            t = jnp.tanh(mm(x, w1) + b1)          # EUP tanh, f32
            s = (1.0 - t * t) * v                 # VPU, f32
            return mm(s, wf)                      # == ((1-t^2)*v) @ W1^T @ S
        return field

    def rk4(field, x0):
        def step(_, x):
            k1 = field(x)
            k2 = field(x + (0.5 * dt) * k1)
            k3 = field(x + (0.5 * dt) * k2)
            k4 = field(x + dt * k3)
            return x + (dt / 6.0) * (k1 + 2.0 * k2 + 2.0 * k3 + k4)
        return jax.lax.fori_loop(0, num_steps, step, x0, unroll=True)

    # ---- forward Hamiltonian flow: qpt = RK4(HDNet field, qp) --------------
    qpt = rk4(make_field(hw1_ref, hb1_ref, hv_ref, hwf_ref), qp)
    qpt_ref[...] = qpt

    # ---- z_encoder + reparameterize -----------------------------------------
    eh = jnp.tanh(mm(qpt, ew1_ref[...].astype(bf16)) + eb1_ref[...])
    mu = mm(eh, ew2m_ref[...].astype(bf16)) + eb2m_ref[...]
    logvar = mm(eh, ew2l_ref[...].astype(bf16)) + eb2l_ref[...]
    mu_ref[...] = mu
    logvar_ref[...] = logvar
    zhat = mu + eps_ref[...] * jnp.exp(0.5 * logvar)

    # ---- z_decoder -----------------------------------------------------------
    zh = jnp.tanh(mm(zhat, zw1_ref[...].astype(bf16)) + zb1_ref[...])
    qpt_hat = mm(zh, zw2_ref[...].astype(bf16)) + zb2_ref[...]
    qpt_hat_ref[...] = qpt_hat

    # ---- inverse Hamiltonian flow: qp_hat = RK4(HDInverse field, qpt_hat) ---
    qp_hat = rk4(make_field(dw1_ref, db1_ref, dv_ref, dwf_ref), qpt_hat)
    qp_hat_ref[...] = qp_hat


# ----------------------------------------------------------------------------
# Wrapper
# ----------------------------------------------------------------------------
def _fold_field_weight(w1, inverse=False):
    """Wf (H, 2d) s.t. ((1-t^2)*v) @ Wf == symplectic field of H = tanh(xW1+b1).v

    dH = s @ W1^T with columns [dq | dp].
    HDNet field        = [dp | -dq]  -> Wf     = [W1[d:].T | -W1[:d].T]
    HDInverseNet field = [-dp | dq]  -> Wf_inv = -Wf
    """
    d = w1.shape[0] // 2
    wf = jnp.concatenate([w1[d:, :].T, -w1[:d, :].T], axis=1)
    return -wf if inverse else wf


def _pick_batch_block(batch):
    for bb in (1024, 512, 256, 128, 64, 32, 16, 8):
        if batch % bb == 0:
            return bb
    return batch


def hdvae_forward(params, q, eps, T=1.0, ode_steps=4):
    B, dim_q = q.shape
    latent = eps.shape[1]
    dim_qp = 2 * dim_q
    hidden = params["hnet"]["w1"].shape[1]

    a = params["adjoint"]
    h = params["hnet"]
    hd = params["hnet_dec"]
    e = params["encoder"]
    d = params["decoder"]

    # One-time trace-time reshuffles (fold symplectic map; split encoder head).
    hwf = _fold_field_weight(h["w1"], inverse=False)
    dwf = _fold_field_weight(hd["w1"], inverse=True)
    ew2m, ew2l = e["w2"][:, :latent], e["w2"][:, latent:]
    eb2m, eb2l = e["b2"][:, :latent], e["b2"][:, latent:]

    inputs = (
        q, eps,
        a["w1"], a["b1"], a["w2"], a["b2"],
        h["w1"], h["b1"], h["v"], hwf,
        hd["w1"], hd["b1"], hd["v"], dwf,
        e["w1"], e["b1"], ew2m, eb2m, ew2l, eb2l,
        d["w1"], d["b1"], d["w2"], d["b2"],
    )

    bb = _pick_batch_block(B)
    grid = (B // bb,)

    def row_spec(ncols):
        return pl.BlockSpec((bb, ncols), lambda i: (i, 0))

    def weight_spec(w):
        return pl.BlockSpec(tuple(w.shape), lambda i: (0,) * w.ndim)

    in_specs = [row_spec(dim_q), row_spec(latent)] + [weight_spec(w) for w in inputs[2:]]

    out_shape = (
        jax.ShapeDtypeStruct((B, dim_qp), jnp.float32),   # qp
        jax.ShapeDtypeStruct((B, dim_qp), jnp.float32),   # qp_hat
        jax.ShapeDtypeStruct((B, dim_qp), jnp.float32),   # qpt
        jax.ShapeDtypeStruct((B, dim_qp), jnp.float32),   # qpt_hat
        jax.ShapeDtypeStruct((B, latent), jnp.float32),   # mu
        jax.ShapeDtypeStruct((B, latent), jnp.float32),   # logvar
    )
    out_specs = (
        row_spec(dim_qp), row_spec(dim_qp), row_spec(dim_qp),
        row_spec(dim_qp), row_spec(latent), row_spec(latent),
    )

    # Rough cost estimate (advisory for XLA scheduling).
    field_flops = 4 * B * dim_qp * hidden                 # 2 matmuls per field eval
    ode_flops = 2 * ode_steps * 4 * field_flops           # 2 ODEs x steps x 4 stages
    mlp_flops = (2 * B * dim_q * hidden * 2               # adjoint
                 + 2 * B * dim_qp * hidden + 4 * B * hidden * latent   # encoder
                 + 2 * B * latent * hidden + 2 * B * hidden * dim_qp)  # decoder
    transcendentals = 2 * ode_steps * 4 * B * hidden + 4 * B * hidden + B * latent
    bytes_accessed = (sum(int(x.size) * 4 for x in inputs)
                      + sum(math.prod(s.shape) * 4 for s in out_shape))

    kernel = functools.partial(_hdvae_kernel, T=float(T), num_steps=int(ode_steps))

    return pl.pallas_call(
        kernel,
        out_shape=out_shape,
        grid_spec=pltpu.PrefetchScalarGridSpec(
            num_scalar_prefetch=0,
            grid=grid,
            in_specs=in_specs,
            out_specs=out_specs,
        ),
        compiler_params=pltpu.CompilerParams(
            dimension_semantics=("parallel",),   # shards batch across TCs on v7x
        ),
        cost_estimate=pl.CostEstimate(
            flops=int(ode_flops + mlp_flops),
            transcendentals=int(transcendentals),
            bytes_accessed=int(bytes_accessed),
        ),
    )(*inputs)


# ----------------------------------------------------------------------------
# Deterministic parameter initialization
# ----------------------------------------------------------------------------
def init_params(key, dim_q, hidden, latent):
    dim_qp = 2 * dim_q
    keys = jax.random.split(key, 16)

    def lin(k, fan_in, fan_out):
        return 0.1 * jax.random.normal(k, (fan_in, fan_out), jnp.float32)

    return {
        "adjoint": {
            "w1": lin(keys[0], dim_q, hidden),
            "b1": 0.01 * jnp.ones((1, hidden), jnp.float32),
            "w2": lin(keys[1], hidden, dim_q),
            "b2": jnp.zeros((1, dim_q), jnp.float32),
        },
        "hnet": {
            "w1": lin(keys[2], dim_qp, hidden),
            "b1": 0.01 * jnp.ones((1, hidden), jnp.float32),
            "v": lin(keys[3], 1, hidden),
        },
        "hnet_dec": {
            "w1": lin(keys[4], dim_qp, hidden),
            "b1": 0.01 * jnp.ones((1, hidden), jnp.float32),
            "v": lin(keys[5], 1, hidden),
        },
        "encoder": {
            "w1": lin(keys[6], dim_qp, hidden),
            "b1": 0.01 * jnp.ones((1, hidden), jnp.float32),
            "w2": lin(keys[7], hidden, 2 * latent),
            "b2": jnp.zeros((1, 2 * latent), jnp.float32),
        },
        "decoder": {
            "w1": lin(keys[8], latent, hidden),
            "b1": 0.01 * jnp.ones((1, hidden), jnp.float32),
            "w2": lin(keys[9], hidden, dim_qp),
            "b2": jnp.zeros((1, dim_qp), jnp.float32),
        },
    }


if __name__ == "__main__":
    B, DIM_Q, HIDDEN, LATENT = 4, 8, 32, 8
    T = 1.0

    key = jax.random.PRNGKey(0)
    k_param, k_q, k_eps = jax.random.split(key, 3)

    params = init_params(k_param, DIM_Q, HIDDEN, LATENT)
    q = jax.random.normal(k_q, (B, DIM_Q), jnp.float32)
    eps = jax.random.normal(k_eps, (B, LATENT), jnp.float32)

    fwd = jax.jit(functools.partial(hdvae_forward, T=T, ode_steps=4))
    qp, qp_hat, qpt, qpt_hat, mu, logvar = fwd(params, q, eps)
    jax.block_until_ready((qp, qp_hat, qpt, qpt_hat, mu, logvar))

    assert qp.shape == (B, 2 * DIM_Q)
    assert qp_hat.shape == (B, 2 * DIM_Q)
    assert qpt.shape == (B, 2 * DIM_Q)
    assert qpt_hat.shape == (B, 2 * DIM_Q)
    assert mu.shape == (B, LATENT)
    assert logvar.shape == (B, LATENT)
    for t in (qp, qp_hat, qpt, qpt_hat, mu, logvar):
        assert bool(jnp.all(jnp.isfinite(t)))

    print("KERNEL_OK")
</pallas_src>

<mosaic_0001>
module attributes {stable_mosaic.version = 11 : i64} {
  func.func @_hdvae_kernel(%arg0: i32, %arg1: memref<4x8xf32, #tpu.memory_space<vmem>>, %arg2: memref<4x8xf32, #tpu.memory_space<vmem>>, %arg3: memref<8x32xf32, #tpu.memory_space<vmem>>, %arg4: memref<1x32xf32, #tpu.memory_space<vmem>>, %arg5: memref<32x8xf32, #tpu.memory_space<vmem>>, %arg6: memref<1x8xf32, #tpu.memory_space<vmem>>, %arg7: memref<16x32xf32, #tpu.memory_space<vmem>>, %arg8: memref<1x32xf32, #tpu.memory_space<vmem>>, %arg9: memref<1x32xf32, #tpu.memory_space<vmem>>, %arg10: memref<32x16xf32, #tpu.memory_space<vmem>>, %arg11: memref<16x32xf32, #tpu.memory_space<vmem>>, %arg12: memref<1x32xf32, #tpu.memory_space<vmem>>, %arg13: memref<1x32xf32, #tpu.memory_space<vmem>>, %arg14: memref<32x16xf32, #tpu.memory_space<vmem>>, %arg15: memref<16x32xf32, #tpu.memory_space<vmem>>, %arg16: memref<1x32xf32, #tpu.memory_space<vmem>>, %arg17: memref<32x8xf32, #tpu.memory_space<vmem>>, %arg18: memref<1x8xf32, #tpu.memory_space<vmem>>, %arg19: memref<32x8xf32, #tpu.memory_space<vmem>>, %arg20: memref<1x8xf32, #tpu.memory_space<vmem>>, %arg21: memref<8x32xf32, #tpu.memory_space<vmem>>, %arg22: memref<1x32xf32, #tpu.memory_space<vmem>>, %arg23: memref<32x16xf32, #tpu.memory_space<vmem>>, %arg24: memref<1x16xf32, #tpu.memory_space<vmem>>, %arg25: memref<4x16xf32, #tpu.memory_space<vmem>>, %arg26: memref<4x16xf32, #tpu.memory_space<vmem>>, %arg27: memref<4x16xf32, #tpu.memory_space<vmem>>, %arg28: memref<4x16xf32, #tpu.memory_space<vmem>>, %arg29: memref<4x8xf32, #tpu.memory_space<vmem>>, %arg30: memref<4x8xf32, #tpu.memory_space<vmem>>) attributes {dimension_semantics = [#tpu.dimension_semantics<parallel>], iteration_bounds = array<i64: 1>, scalar_prefetch = 0 : i64, scratch_operands = 0 : i64, tpu.core_type = #tpu.core_type<tc>, window_params = [{transform_indices = @transform_0, window_bounds = array<i64: 4, 8>}, {transform_indices = @transform_1, window_bounds = array<i64: 4, 8>}, {pipeline_mode = #tpu.pipeline_mode<synchronous>, transform_indices = @transform_2, window_bounds = array<i64: 8, 32>}, {pipeline_mode = #tpu.pipeline_mode<synchronous>, transform_indices = @transform_3, window_bounds = array<i64: 1, 32>}, {pipeline_mode = #tpu.pipeline_mode<synchronous>, transform_indices = @transform_4, window_bounds = array<i64: 32, 8>}, {pipeline_mode = #tpu.pipeline_mode<synchronous>, transform_indices = @transform_5, window_bounds = array<i64: 1, 8>}, {pipeline_mode = #tpu.pipeline_mode<synchronous>, transform_indices = @transform_6, window_bounds = array<i64: 16, 32>}, {pipeline_mode = #tpu.pipeline_mode<synchronous>, transform_indices = @transform_7, window_bounds = array<i64: 1, 32>}, {pipeline_mode = #tpu.pipeline_mode<synchronous>, transform_indices = @transform_8, window_bounds = array<i64: 1, 32>}, {pipeline_mode = #tpu.pipeline_mode<synchronous>, transform_indices = @transform_9, window_bounds = array<i64: 32, 16>}, {pipeline_mode = #tpu.pipeline_mode<synchronous>, transform_indices = @transform_10, window_bounds = array<i64: 16, 32>}, {pipeline_mode = #tpu.pipeline_mode<synchronous>, transform_indices = @transform_11, window_bounds = array<i64: 1, 32>}, {pipeline_mode = #tpu.pipeline_mode<synchronous>, transform_indices = @transform_12, window_bounds = array<i64: 1, 32>}, {pipeline_mode = #tpu.pipeline_mode<synchronous>, transform_indices = @transform_13, window_bounds = array<i64: 32, 16>}, {pipeline_mode = #tpu.pipeline_mode<synchronous>, transform_indices = @transform_14, window_bounds = array<i64: 16, 32>}, {pipeline_mode = #tpu.pipeline_mode<synchronous>, transform_indices = @transform_15, window_bounds = array<i64: 1, 32>}, {pipeline_mode = #tpu.pipeline_mode<synchronous>, transform_indices = @transform_16, window_bounds = array<i64: 32, 8>}, {pipeline_mode = #tpu.pipeline_mode<synchronous>, transform_indices = @transform_17, window_bounds = array<i64: 1, 8>}, {pipeline_mode = #tpu.pipeline_mode<synchronous>, transform_indices = @transform_18, window_bounds = array<i64: 32, 8>}, {pipeline_mode = #tpu.pipeline_mode<synchronous>, transform_indices = @transform_19, window_bounds = array<i64: 1, 8>}, {pipeline_mode = #tpu.pipeline_mode<synchronous>, transform_indices = @transform_20, window_bounds = array<i64: 8, 32>}, {pipeline_mode = #tpu.pipeline_mode<synchronous>, transform_indices = @transform_21, window_bounds = array<i64: 1, 32>}, {pipeline_mode = #tpu.pipeline_mode<synchronous>, transform_indices = @transform_22, window_bounds = array<i64: 32, 16>}, {pipeline_mode = #tpu.pipeline_mode<synchronous>, transform_indices = @transform_23, window_bounds = array<i64: 1, 16>}, {transform_indices = @transform_24, window_bounds = array<i64: 4, 16>}, {transform_indices = @transform_25, window_bounds = array<i64: 4, 16>}, {transform_indices = @transform_26, window_bounds = array<i64: 4, 16>}, {transform_indices = @transform_27, window_bounds = array<i64: 4, 16>}, {transform_indices = @transform_28, window_bounds = array<i64: 4, 8>}, {transform_indices = @transform_29, window_bounds = array<i64: 4, 8>}]} {
    %c0 = arith.constant 0 : index
    %c0_0 = arith.constant 0 : index
    %0 = vector.load %arg1[%c0, %c0_0] : memref<4x8xf32, #tpu.memory_space<vmem>>, vector<4x8xf32>
    %c0_1 = arith.constant 0 : index
    %c0_2 = arith.constant 0 : index
    %1 = vector.load %arg3[%c0_1, %c0_2] : memref<8x32xf32, #tpu.memory_space<vmem>>, vector<8x32xf32>
    %2 = arith.truncf %1 : vector<8x32xf32> to vector<8x32xbf16>
    %3 = arith.truncf %0 : vector<4x8xf32> to vector<4x8xbf16>
    %cst = arith.constant dense<0.000000e+00> : vector<4x32xf32>
    %4 = tpu.matmul %3, %2, %cst {dimension_numbers = #tpu.dot_dimension_numbers<[1], [0], [0], [1], [0, 0, 1, 1], [], []>} : vector<4x8xbf16>, vector<8x32xbf16>, vector<4x32xf32> -> vector<4x32xf32>
    %c0_3 = arith.constant 0 : index
    %c0_4 = arith.constant 0 : index
    %5 = vector.load %arg4[%c0_3, %c0_4] : memref<1x32xf32, #tpu.memory_space<vmem>>, vector<1x32xf32>
    %6 = vector.broadcast %5 : vector<1x32xf32> to vector<4x32xf32>
    %7 = arith.addf %4, %6 : vector<4x32xf32>
    %8 = math.tanh %7 : vector<4x32xf32>
    %c0_5 = arith.constant 0 : index
    %c0_6 = arith.constant 0 : index
    %9 = vector.load %arg5[%c0_5, %c0_6] : memref<32x8xf32, #tpu.memory_space<vmem>>, vector<32x8xf32>
    %10 = arith.truncf %9 : vector<32x8xf32> to vector<32x8xbf16>
    %11 = arith.truncf %8 : vector<4x32xf32> to vector<4x32xbf16>
    %cst_7 = arith.constant dense<0.000000e+00> : vector<4x8xf32>
    %12 = tpu.matmul %11, %10, %cst_7 {dimension_numbers = #tpu.dot_dimension_numbers<[1], [0], [0], [1], [0, 0, 1, 1], [], []>} : vector<4x32xbf16>, vector<32x8xbf16>, vector<4x8xf32> -> vector<4x8xf32>
    %c0_8 = arith.constant 0 : index
    %c0_9 = arith.constant 0 : index
    %13 = vector.load %arg6[%c0_8, %c0_9] : memref<1x8xf32, #tpu.memory_space<vmem>>, vector<1x8xf32>
    %14 = vector.broadcast %13 : vector<1x8xf32> to vector<4x8xf32>
    %15 = arith.addf %12, %14 : vector<4x8xf32>
    %16 = tpu.concatenate %0, %15 in 1 : vector<4x8xf32>, vector<4x8xf32> -> vector<4x16xf32>
    %c0_10 = arith.constant 0 : index
    %c0_11 = arith.constant 0 : index
    %17 = vector.load %arg25[%c0_10, %c0_11] : memref<4x16xf32, #tpu.memory_space<vmem>>, vector<4x16xf32>
    tpu.vector_store %arg25[%c0_10, %c0_11], %16 {strides = array<i32>} : memref<4x16xf32, #tpu.memory_space<vmem>>, vector<4x16xf32>,
    %c0_12 = arith.constant 0 : index
    %c0_13 = arith.constant 0 : index
    %18 = vector.load %arg7[%c0_12, %c0_13] : memref<16x32xf32, #tpu.memory_space<vmem>>, vector<16x32xf32>
    %19 = arith.truncf %18 : vector<16x32xf32> to vector<16x32xbf16>
    %c0_14 = arith.constant 0 : index
    %c0_15 = arith.constant 0 : index
    %20 = vector.load %arg10[%c0_14, %c0_15] : memref<32x16xf32, #tpu.memory_space<vmem>>, vector<32x16xf32>
    %21 = arith.truncf %20 : vector<32x16xf32> to vector<32x16xbf16>
    %c0_16 = arith.constant 0 : index
    %c0_17 = arith.constant 0 : index
    %22 = vector.load %arg8[%c0_16, %c0_17] : memref<1x32xf32, #tpu.memory_space<vmem>>, vector<1x32xf32>
    %23 = vector.shape_cast %22 : vector<1x32xf32> to vector<1x32xf32>
    %24 = vector.broadcast %23 : vector<1x32xf32> to vector<4x32xf32>
    %c0_18 = arith.constant 0 : index
    %c0_19 = arith.constant 0 : index
    %25 = vector.load %arg9[%c0_18, %c0_19] : memref<1x32xf32, #tpu.memory_space<vmem>>, vector<1x32xf32>
    %26 = vector.shape_cast %25 : vector<1x32xf32> to vector<1x32xf32>
    %27 = vector.broadcast %26 : vector<1x32xf32> to vector<4x32xf32>
    %c0_i32 = arith.constant 0 : i32
    %28 = arith.truncf %16 : vector<4x16xf32> to vector<4x16xbf16>
    %cst_20 = arith.constant dense<0.000000e+00> : vector<4x32xf32>
    %29 = tpu.matmul %28, %19, %cst_20 {dimension_numbers = #tpu.dot_dimension_numbers<[1], [0], [0], [1], [0, 0, 1, 1], [], []>} : vector<4x16xbf16>, vector<16x32xbf16>, vector<4x32xf32> -> vector<4x32xf32>
    %30 = arith.addf %29, %24 : vector<4x32xf32>
    %31 = math.tanh %30 : vector<4x32xf32>
    %32 = arith.mulf %31, %31 : vector<4x32xf32>
    %cst_21 = arith.constant 1.000000e+00 : f32
    %33 = vector.broadcast %cst_21 : f32 to vector<4x32xf32>
    %34 = arith.subf %33, %32 : vector<4x32xf32>
    %35 = arith.mulf %34, %27 : vector<4x32xf32>
    %36 = arith.truncf %35 : vector<4x32xf32> to vector<4x32xbf16>
    %cst_22 = arith.constant dense<0.000000e+00> : vector<4x16xf32>
    %37 = tpu.matmul %36, %21, %cst_22 {dimension_numbers = #tpu.dot_dimension_numbers<[1], [0], [0], [1], [0, 0, 1, 1], [], []>} : vector<4x32xbf16>, vector<32x16xbf16>, vector<4x16xf32> -> vector<4x16xf32>
    %cst_23 = arith.constant 1.250000e-01 : f32
    %38 = vector.broadcast %cst_23 : f32 to vector<4x16xf32>
    %39 = arith.mulf %38, %37 : vector<4x16xf32>
    %40 = arith.addf %16, %39 : vector<4x16xf32>
    %41 = arith.truncf %40 : vector<4x16xf32> to vector<4x16xbf16>
    %cst_24 = arith.constant dense<0.000000e+00> : vector<4x32xf32>
    %42 = tpu.matmul %41, %19, %cst_24 {dimension_numbers = #tpu.dot_dimension_numbers<[1], [0], [0], [1], [0, 0, 1, 1], [], []>} : vector<4x16xbf16>, vector<16x32xbf16>, vector<4x32xf32> -> vector<4x32xf32>
    %43 = arith.addf %42, %24 : vector<4x32xf32>
    %44 = math.tanh %43 : vector<4x32xf32>
    %45 = arith.mulf %44, %44 : vector<4x32xf32>
    %cst_25 = arith.constant 1.000000e+00 : f32
    %46 = vector.broadcast %cst_25 : f32 to vector<4x32xf32>
    %47 = arith.subf %46, %45 : vector<4x32xf32>
    %48 = arith.mulf %47, %27 : vector<4x32xf32>
    %49 = arith.truncf %48 : vector<4x32xf32> to vector<4x32xbf16>
    %cst_26 = arith.constant dense<0.000000e+00> : vector<4x16xf32>
    %50 = tpu.matmul %49, %21, %cst_26 {dimension_numbers = #tpu.dot_dimension_numbers<[1], [0], [0], [1], [0, 0, 1, 1], [], []>} : vector<4x32xbf16>, vector<32x16xbf16>, vector<4x16xf32> -> vector<4x16xf32>
    %cst_27 = arith.constant 1.250000e-01 : f32
    %51 = vector.broadcast %cst_27 : f32 to vector<4x16xf32>
    %52 = arith.mulf %51, %50 : vector<4x16xf32>
    %53 = arith.addf %16, %52 : vector<4x16xf32>
    %54 = arith.truncf %53 : vector<4x16xf32> to vector<4x16xbf16>
    %cst_28 = arith.constant dense<0.000000e+00> : vector<4x32xf32>
    %55 = tpu.matmul %54, %19, %cst_28 {dimension_numbers = #tpu.dot_dimension_numbers<[1], [0], [0], [1], [0, 0, 1, 1], [], []>} : vector<4x16xbf16>, vector<16x32xbf16>, vector<4x32xf32> -> vector<4x32xf32>
    %56 = arith.addf %55, %24 : vector<4x32xf32>
    %57 = math.tanh %56 : vector<4x32xf32>
    %58 = arith.mulf %57, %57 : vector<4x32xf32>
    %cst_29 = arith.constant 1.000000e+00 : f32
    %59 = vector.broadcast %cst_29 : f32 to vector<4x32xf32>
    %60 = arith.subf %59, %58 : vector<4x32xf32>
    %61 = arith.mulf %60, %27 : vector<4x32xf32>
    %62 = arith.truncf %61 : vector<4x32xf32> to vector<4x32xbf16>
    %cst_30 = arith.constant dense<0.000000e+00> : vector<4x16xf32>
    %63 = tpu.matmul %62, %21, %cst_30 {dimension_numbers = #tpu.dot_dimension_numbers<[1], [0], [0], [1], [0, 0, 1, 1], [], []>} : vector<4x32xbf16>, vector<32x16xbf16>, vector<4x16xf32> -> vector<4x16xf32>
    %cst_31 = arith.constant 2.500000e-01 : f32
    %64 = vector.broadcast %cst_31 : f32 to vector<4x16xf32>
    %65 = arith.mulf %64, %63 : vector<4x16xf32>
    %66 = arith.addf %16, %65 : vector<4x16xf32>
    %67 = arith.truncf %66 : vector<4x16xf32> to vector<4x16xbf16>
    %cst_32 = arith.constant dense<0.000000e+00> : vector<4x32xf32>
    %68 = tpu.matmul %67, %19, %cst_32 {dimension_numbers = #tpu.dot_dimension_numbers<[1], [0], [0], [1], [0, 0, 1, 1], [], []>} : vector<4x16xbf16>, vector<16x32xbf16>, vector<4x32xf32> -> vector<4x32xf32>
    %69 = arith.addf %68, %24 : vector<4x32xf32>
    %70 = math.tanh %69 : vector<4x32xf32>
    %71 = arith.mulf %70, %70 : vector<4x32xf32>
    %cst_33 = arith.constant 1.000000e+00 : f32
    %72 = vector.broadcast %cst_33 : f32 to vector<4x32xf32>
    %73 = arith.subf %72, %71 : vector<4x32xf32>
    %74 = arith.mulf %73, %27 : vector<4x32xf32>
    %75 = arith.truncf %74 : vector<4x32xf32> to vector<4x32xbf16>
    %cst_34 = arith.constant dense<0.000000e+00> : vector<4x16xf32>
    %76 = tpu.matmul %75, %21, %cst_34 {dimension_numbers = #tpu.dot_dimension_numbers<[1], [0], [0], [1], [0, 0, 1, 1], [], []>} : vector<4x32xbf16>, vector<32x16xbf16>, vector<4x16xf32> -> vector<4x16xf32>
    %cst_35 = arith.constant 2.000000e+00 : f32
    %77 = vector.broadcast %cst_35 : f32 to vector<4x16xf32>
    %78 = arith.mulf %77, %50 : vector<4x16xf32>
    %79 = arith.addf %37, %78 : vector<4x16xf32>
    %cst_36 = arith.constant 2.000000e+00 : f32
    %80 = vector.broadcast %cst_36 : f32 to vector<4x16xf32>
    %81 = arith.mulf %80, %63 : vector<4x16xf32>
    %82 = arith.addf %79, %81 : vector<4x16xf32>
    %83 = arith.addf %82, %76 : vector<4x16xf32>
    %cst_37 = arith.constant 0.0416666679 : f32
    %84 = vector.broadcast %cst_37 : f32 to vector<4x16xf32>
    %85 = arith.mulf %84, %83 : vector<4x16xf32>
    %86 = arith.addf %16, %85 : vector<4x16xf32>
    %c1_i32 = arith.constant 1 : i32
    %87 = arith.truncf %86 : vector<4x16xf32> to vector<4x16xbf16>
    %cst_38 = arith.constant dense<0.000000e+00> : vector<4x32xf32>
    %88 = tpu.matmul %87, %19, %cst_38 {dimension_numbers = #tpu.dot_dimension_numbers<[1], [0], [0], [1], [0, 0, 1, 1], [], []>} : vector<4x16xbf16>, vector<16x32xbf16>, vector<4x32xf32> -> vector<4x32xf32>
    %89 = arith.addf %88, %24 : vector<4x32xf32>
    %90 = math.tanh %89 : vector<4x32xf32>
    %91 = arith.mulf %90, %90 : vector<4x32xf32>
    %cst_39 = arith.constant 1.000000e+00 : f32
    %92 = vector.broadcast %cst_39 : f32 to vector<4x32xf32>
    %93 = arith.subf %92, %91 : vector<4x32xf32>
    %94 = arith.mulf %93, %27 : vector<4x32xf32>
    %95 = arith.truncf %94 : vector<4x32xf32> to vector<4x32xbf16>
    %cst_40 = arith.constant dense<0.000000e+00> : vector<4x16xf32>
    %96 = tpu.matmul %95, %21, %cst_40 {dimension_numbers = #tpu.dot_dimension_numbers<[1], [0], [0], [1], [0, 0, 1, 1], [], []>} : vector<4x32xbf16>, vector<32x16xbf16>, vector<4x16xf32> -> vector<4x16xf32>
    %cst_41 = arith.constant 1.250000e-01 : f32
    %97 = vector.broadcast %cst_41 : f32 to vector<4x16xf32>
    %98 = arith.mulf %97, %96 : vector<4x16xf32>
    %99 = arith.addf %86, %98 : vector<4x16xf32>
    %100 = arith.truncf %99 : vector<4x16xf32> to vector<4x16xbf16>
    %cst_42 = arith.constant dense<0.000000e+00> : vector<4x32xf32>
    %101 = tpu.matmul %100, %19, %cst_42 {dimension_numbers = #tpu.dot_dimension_numbers<[1], [0], [0], [1], [0, 0, 1, 1], [], []>} : vector<4x16xbf16>, vector<16x32xbf16>, vector<4x32xf32> -> vector<4x32xf32>
    %102 = arith.addf %101, %24 : vector<4x32xf32>
    %103 = math.tanh %102 : vector<4x32xf32>
    %104 = arith.mulf %103, %103 : vector<4x32xf32>
    %cst_43 = arith.constant 1.000000e+00 : f32
    %105 = vector.broadcast %cst_43 : f32 to vector<4x32xf32>
    %106 = arith.subf %105, %104 : vector<4x32xf32>
    %107 = arith.mulf %106, %27 : vector<4x32xf32>
    %108 = arith.truncf %107 : vector<4x32xf32> to vector<4x32xbf16>
    %cst_44 = arith.constant dense<0.000000e+00> : vector<4x16xf32>
    %109 = tpu.matmul %108, %21, %cst_44 {dimension_numbers = #tpu.dot_dimension_numbers<[1], [0], [0], [1], [0, 0, 1, 1], [], []>} : vector<4x32xbf16>, vector<32x16xbf16>, vector<4x16xf32> -> vector<4x16xf32>
    %cst_45 = arith.constant 1.250000e-01 : f32
    %110 = vector.broadcast %cst_45 : f32 to vector<4x16xf32>
    %111 = arith.mulf %110, %109 : vector<4x16xf32>
    %112 = arith.addf %86, %111 : vector<4x16xf32>
    %113 = arith.truncf %112 : vector<4x16xf32> to vector<4x16xbf16>
    %cst_46 = arith.constant dense<0.000000e+00> : vector<4x32xf32>
    %114 = tpu.matmul %113, %19, %cst_46 {dimension_numbers = #tpu.dot_dimension_numbers<[1], [0], [0], [1], [0, 0, 1, 1], [], []>} : vector<4x16xbf16>, vector<16x32xbf16>, vector<4x32xf32> -> vector<4x32xf32>
    %115 = arith.addf %114, %24 : vector<4x32xf32>
    %116 = math.tanh %115 : vector<4x32xf32>
    %117 = arith.mulf %116, %116 : vector<4x32xf32>
    %cst_47 = arith.constant 1.000000e+00 : f32
    %118 = vector.broadcast %cst_47 : f32 to vector<4x32xf32>
    %119 = arith.subf %118, %117 : vector<4x32xf32>
    %120 = arith.mulf %119, %27 : vector<4x32xf32>
    %121 = arith.truncf %120 : vector<4x32xf32> to vector<4x32xbf16>
    %cst_48 = arith.constant dense<0.000000e+00> : vector<4x16xf32>
    %122 = tpu.matmul %121, %21, %cst_48 {dimension_numbers = #tpu.dot_dimension_numbers<[1], [0], [0], [1], [0, 0, 1, 1], [], []>} : vector<4x32xbf16>, vector<32x16xbf16>, vector<4x16xf32> -> vector<4x16xf32>
    %cst_49 = arith.constant 2.500000e-01 : f32
    %123 = vector.broadcast %cst_49 : f32 to vector<4x16xf32>
    %124 = arith.mulf %123, %122 : vector<4x16xf32>
    %125 = arith.addf %86, %124 : vector<4x16xf32>
    %126 = arith.truncf %125 : vector<4x16xf32> to vector<4x16xbf16>
    %cst_50 = arith.constant dense<0.000000e+00> : vector<4x32xf32>
    %127 = tpu.matmul %126, %19, %cst_50 {dimension_numbers = #tpu.dot_dimension_numbers<[1], [0], [0], [1], [0, 0, 1, 1], [], []>} : vector<4x16xbf16>, vector<16x32xbf16>, vector<4x32xf32> -> vector<4x32xf32>
    %128 = arith.addf %127, %24 : vector<4x32xf32>
    %129 = math.tanh %128 : vector<4x32xf32>
    %130 = arith.mulf %129, %129 : vector<4x32xf32>
    %cst_51 = arith.constant 1.000000e+00 : f32
    %131 = vector.broadcast %cst_51 : f32 to vector<4x32xf32>
    %132 = arith.subf %131, %130 : vector<4x32xf32>
    %133 = arith.mulf %132, %27 : vector<4x32xf32>
    %134 = arith.truncf %133 : vector<4x32xf32> to vector<4x32xbf16>
    %cst_52 = arith.constant dense<0.000000e+00> : vector<4x16xf32>
    %135 = tpu.matmul %134, %21, %cst_52 {dimension_numbers = #tpu.dot_dimension_numbers<[1], [0], [0], [1], [0, 0, 1, 1], [], []>} : vector<4x32xbf16>, vector<32x16xbf16>, vector<4x16xf32> -> vector<4x16xf32>
    %cst_53 = arith.constant 2.000000e+00 : f32
    %136 = vector.broadcast %cst_53 : f32 to vector<4x16xf32>
    %137 = arith.mulf %136, %109 : vector<4x16xf32>
    %138 = arith.addf %96, %137 : vector<4x16xf32>
    %cst_54 = arith.constant 2.000000e+00 : f32
    %139 = vector.broadcast %cst_54 : f32 to vector<4x16xf32>
    %140 = arith.mulf %139, %122 : vector<4x16xf32>
    %141 = arith.addf %138, %140 : vector<4x16xf32>
    %142 = arith.addf %141, %135 : vector<4x16xf32>
    %cst_55 = arith.constant 0.0416666679 : f32
    %143 = vector.broadcast %cst_55 : f32 to vector<4x16xf32>
    %144 = arith.mulf %143, %142 : vector<4x16xf32>
    %145 = arith.addf %86, %144 : vector<4x16xf32>
    %c2_i32 = arith.constant 2 : i32
    %146 = arith.truncf %145 : vector<4x16xf32> to vector<4x16xbf16>
    %cst_56 = arith.constant dense<0.000000e+00> : vector<4x32xf32>
    %147 = tpu.matmul %146, %19, %cst_56 {dimension_numbers = #tpu.dot_dimension_numbers<[1], [0], [0], [1], [0, 0, 1, 1], [], []>} : vector<4x16xbf16>, vector<16x32xbf16>, vector<4x32xf32> -> vector<4x32xf32>
    %148 = arith.addf %147, %24 : vector<4x32xf32>
    %149 = math.tanh %148 : vector<4x32xf32>
    %150 = arith.mulf %149, %149 : vector<4x32xf32>
    %cst_57 = arith.constant 1.000000e+00 : f32
    %151 = vector.broadcast %cst_57 : f32 to vector<4x32xf32>
    %152 = arith.subf %151, %150 : vector<4x32xf32>
    %153 = arith.mulf %152, %27 : vector<4x32xf32>
    %154 = arith.truncf %153 : vector<4x32xf32> to vector<4x32xbf16>
    %cst_58 = arith.constant dense<0.000000e+00> : vector<4x16xf32>
    %155 = tpu.matmul %154, %21, %cst_58 {dimension_numbers = #tpu.dot_dimension_numbers<[1], [0], [0], [1], [0, 0, 1, 1], [], []>} : vector<4x32xbf16>, vector<32x16xbf16>, vector<4x16xf32> -> vector<4x16xf32>
    %cst_59 = arith.constant 1.250000e-01 : f32
    %156 = vector.broadcast %cst_59 : f32 to vector<4x16xf32>
    %157 = arith.mulf %156, %155 : vector<4x16xf32>
    %158 = arith.addf %145, %157 : vector<4x16xf32>
    %159 = arith.truncf %158 : vector<4x16xf32> to vector<4x16xbf16>
    %cst_60 = arith.constant dense<0.000000e+00> : vector<4x32xf32>
    %160 = tpu.matmul %159, %19, %cst_60 {dimension_numbers = #tpu.dot_dimension_numbers<[1], [0], [0], [1], [0, 0, 1, 1], [], []>} : vector<4x16xbf16>, vector<16x32xbf16>, vector<4x32xf32> -> vector<4x32xf32>
    %161 = arith.addf %160, %24 : vector<4x32xf32>
    %162 = math.tanh %161 : vector<4x32xf32>
    %163 = arith.mulf %162, %162 : vector<4x32xf32>
    %cst_61 = arith.constant 1.000000e+00 : f32
    %164 = vector.broadcast %cst_61 : f32 to vector<4x32xf32>
    %165 = arith.subf %164, %163 : vector<4x32xf32>
    %166 = arith.mulf %165, %27 : vector<4x32xf32>
    %167 = arith.truncf %166 : vector<4x32xf32> to vector<4x32xbf16>
    %cst_62 = arith.constant dense<0.000000e+00> : vector<4x16xf32>
    %168 = tpu.matmul %167, %21, %cst_62 {dimension_numbers = #tpu.dot_dimension_numbers<[1], [0], [0], [1], [0, 0, 1, 1], [], []>} : vector<4x32xbf16>, vector<32x16xbf16>, vector<4x16xf32> -> vector<4x16xf32>
    %cst_63 = arith.constant 1.250000e-01 : f32
    %169 = vector.broadcast %cst_63 : f32 to vector<4x16xf32>
    %170 = arith.mulf %169, %168 : vector<4x16xf32>
    %171 = arith.addf %145, %170 : vector<4x16xf32>
    %172 = arith.truncf %171 : vector<4x16xf32> to vector<4x16xbf16>
    %cst_64 = arith.constant dense<0.000000e+00> : vector<4x32xf32>
    %173 = tpu.matmul %172, %19, %cst_64 {dimension_numbers = #tpu.dot_dimension_numbers<[1], [0], [0], [1], [0, 0, 1, 1], [], []>} : vector<4x16xbf16>, vector<16x32xbf16>, vector<4x32xf32> -> vector<4x32xf32>
    %174 = arith.addf %173, %24 : vector<4x32xf32>
    %175 = math.tanh %174 : vector<4x32xf32>
    %176 = arith.mulf %175, %175 : vector<4x32xf32>
    %cst_65 = arith.constant 1.000000e+00 : f32
    %177 = vector.broadcast %cst_65 : f32 to vector<4x32xf32>
    %178 = arith.subf %177, %176 : vector<4x32xf32>
    %179 = arith.mulf %178, %27 : vector<4x32xf32>
    %180 = arith.truncf %179 : vector<4x32xf32> to vector<4x32xbf16>
    %cst_66 = arith.constant dense<0.000000e+00> : vector<4x16xf32>
    %181 = tpu.matmul %180, %21, %cst_66 {dimension_numbers = #tpu.dot_dimension_numbers<[1], [0], [0], [1], [0, 0, 1, 1], [], []>} : vector<4x32xbf16>, vector<32x16xbf16>, vector<4x16xf32> -> vector<4x16xf32>
    %cst_67 = arith.constant 2.500000e-01 : f32
    %182 = vector.broadcast %cst_67 : f32 to vector<4x16xf32>
    %183 = arith.mulf %182, %181 : vector<4x16xf32>
    %184 = arith.addf %145, %183 : vector<4x16xf32>
    %185 = arith.truncf %184 : vector<4x16xf32> to vector<4x16xbf16>
    %cst_68 = arith.constant dense<0.000000e+00> : vector<4x32xf32>
    %186 = tpu.matmul %185, %19, %cst_68 {dimension_numbers = #tpu.dot_dimension_numbers<[1], [0], [0], [1], [0, 0, 1, 1], [], []>} : vector<4x16xbf16>, vector<16x32xbf16>, vector<4x32xf32> -> vector<4x32xf32>
    %187 = arith.addf %186, %24 : vector<4x32xf32>
    %188 = math.tanh %187 : vector<4x32xf32>
    %189 = arith.mulf %188, %188 : vector<4x32xf32>
    %cst_69 = arith.constant 1.000000e+00 : f32
    %190 = vector.broadcast %cst_69 : f32 to vector<4x32xf32>
    %191 = arith.subf %190, %189 : vector<4x32xf32>
    %192 = arith.mulf %191, %27 : vector<4x32xf32>
    %193 = arith.truncf %192 : vector<4x32xf32> to vector<4x32xbf16>
    %cst_70 = arith.constant dense<0.000000e+00> : vector<4x16xf32>
    %194 = tpu.matmul %193, %21, %cst_70 {dimension_numbers = #tpu.dot_dimension_numbers<[1], [0], [0], [1], [0, 0, 1, 1], [], []>} : vector<4x32xbf16>, vector<32x16xbf16>, vector<4x16xf32> -> vector<4x16xf32>
    %cst_71 = arith.constant 2.000000e+00 : f32
    %195 = vector.broadcast %cst_71 : f32 to vector<4x16xf32>
    %196 = arith.mulf %195, %168 : vector<4x16xf32>
    %197 = arith.addf %155, %196 : vector<4x16xf32>
    %cst_72 = arith.constant 2.000000e+00 : f32
    %198 = vector.broadcast %cst_72 : f32 to vector<4x16xf32>
    %199 = arith.mulf %198, %181 : vector<4x16xf32>
    %200 = arith.addf %197, %199 : vector<4x16xf32>
    %201 = arith.addf %200, %194 : vector<4x16xf32>
    %cst_73 = arith.constant 0.0416666679 : f32
    %202 = vector.broadcast %cst_73 : f32 to vector<4x16xf32>
    %203 = arith.mulf %202, %201 : vector<4x16xf32>
    %204 = arith.addf %145, %203 : vector<4x16xf32>
    %c3_i32 = arith.constant 3 : i32
    %205 = arith.truncf %204 : vector<4x16xf32> to vector<4x16xbf16>
    %cst_74 = arith.constant dense<0.000000e+00> : vector<4x32xf32>
    %206 = tpu.matmul %205, %19, %cst_74 {dimension_numbers = #tpu.dot_dimension_numbers<[1], [0], [0], [1], [0, 0, 1, 1], [], []>} : vector<4x16xbf16>, vector<16x32xbf16>, vector<4x32xf32> -> vector<4x32xf32>
    %207 = arith.addf %206, %24 : vector<4x32xf32>
    %208 = math.tanh %207 : vector<4x32xf32>
    %209 = arith.mulf %208, %208 : vector<4x32xf32>
    %cst_75 = arith.constant 1.000000e+00 : f32
    %210 = vector.broadcast %cst_75 : f32 to vector<4x32xf32>
    %211 = arith.subf %210, %209 : vector<4x32xf32>
    %212 = arith.mulf %211, %27 : vector<4x32xf32>
    %213 = arith.truncf %212 : vector<4x32xf32> to vector<4x32xbf16>
    %cst_76 = arith.constant dense<0.000000e+00> : vector<4x16xf32>
    %214 = tpu.matmul %213, %21, %cst_76 {dimension_numbers = #tpu.dot_dimension_numbers<[1], [0], [0], [1], [0, 0, 1, 1], [], []>} : vector<4x32xbf16>, vector<32x16xbf16>, vector<4x16xf32> -> vector<4x16xf32>
    %cst_77 = arith.constant 1.250000e-01 : f32
    %215 = vector.broadcast %cst_77 : f32 to vector<4x16xf32>
    %216 = arith.mulf %215, %214 : vector<4x16xf32>
    %217 = arith.addf %204, %216 : vector<4x16xf32>
    %218 = arith.truncf %217 : vector<4x16xf32> to vector<4x16xbf16>
    %cst_78 = arith.constant dense<0.000000e+00> : vector<4x32xf32>
    %219 = tpu.matmul %218, %19, %cst_78 {dimension_numbers = #tpu.dot_dimension_numbers<[1], [0], [0], [1], [0, 0, 1, 1], [], []>} : vector<4x16xbf16>, vector<16x32xbf16>, vector<4x32xf32> -> vector<4x32xf32>
    %220 = arith.addf %219, %24 : vector<4x32xf32>
    %221 = math.tanh %220 : vector<4x32xf32>
    %222 = arith.mulf %221, %221 : vector<4x32xf32>
    %cst_79 = arith.constant 1.000000e+00 : f32
    %223 = vector.broadcast %cst_79 : f32 to vector<4x32xf32>
    %224 = arith.subf %223, %222 : vector<4x32xf32>
    %225 = arith.mulf %224, %27 : vector<4x32xf32>
    %226 = arith.truncf %225 : vector<4x32xf32> to vector<4x32xbf16>
    %cst_80 = arith.constant dense<0.000000e+00> : vector<4x16xf32>
    %227 = tpu.matmul %226, %21, %cst_80 {dimension_numbers = #tpu.dot_dimension_numbers<[1], [0], [0], [1], [0, 0, 1, 1], [], []>} : vector<4x32xbf16>, vector<32x16xbf16>, vector<4x16xf32> -> vector<4x16xf32>
    %cst_81 = arith.constant 1.250000e-01 : f32
    %228 = vector.broadcast %cst_81 : f32 to vector<4x16xf32>
    %229 = arith.mulf %228, %227 : vector<4x16xf32>
    %230 = arith.addf %204, %229 : vector<4x16xf32>
    %231 = arith.truncf %230 : vector<4x16xf32> to vector<4x16xbf16>
    %cst_82 = arith.constant dense<0.000000e+00> : vector<4x32xf32>
    %232 = tpu.matmul %231, %19, %cst_82 {dimension_numbers = #tpu.dot_dimension_numbers<[1], [0], [0], [1], [0, 0, 1, 1], [], []>} : vector<4x16xbf16>, vector<16x32xbf16>, vector<4x32xf32> -> vector<4x32xf32>
    %233 = arith.addf %232, %24 : vector<4x32xf32>
    %234 = math.tanh %233 : vector<4x32xf32>
    %235 = arith.mulf %234, %234 : vector<4x32xf32>
    %cst_83 = arith.constant 1.000000e+00 : f32
    %236 = vector.broadcast %cst_83 : f32 to vector<4x32xf32>
    %237 = arith.subf %236, %235 : vector<4x32xf32>
    %238 = arith.mulf %237, %27 : vector<4x32xf32>
    %239 = arith.truncf %238 : vector<4x32xf32> to vector<4x32xbf16>
    %cst_84 = arith.constant dense<0.000000e+00> : vector<4x16xf32>
    %240 = tpu.matmul %239, %21, %cst_84 {dimension_numbers = #tpu.dot_dimension_numbers<[1], [0], [0], [1], [0, 0, 1, 1], [], []>} : vector<4x32xbf16>, vector<32x16xbf16>, vector<4x16xf32> -> vector<4x16xf32>
    %cst_85 = arith.constant 2.500000e-01 : f32
    %241 = vector.broadcast %cst_85 : f32 to vector<4x16xf32>
    %242 = arith.mulf %241, %240 : vector<4x16xf32>
    %243 = arith.addf %204, %242 : vector<4x16xf32>
    %244 = arith.truncf %243 : vector<4x16xf32> to vector<4x16xbf16>
    %cst_86 = arith.constant dense<0.000000e+00> : vector<4x32xf32>
    %245 = tpu.matmul %244, %19, %cst_86 {dimension_numbers = #tpu.dot_dimension_numbers<[1], [0], [0], [1], [0, 0, 1, 1], [], []>} : vector<4x16xbf16>, vector<16x32xbf16>, vector<4x32xf32> -> vector<4x32xf32>
    %246 = arith.addf %245, %24 : vector<4x32xf32>
    %247 = math.tanh %246 : vector<4x32xf32>
    %248 = arith.mulf %247, %247 : vector<4x32xf32>
    %cst_87 = arith.constant 1.000000e+00 : f32
    %249 = vector.broadcast %cst_87 : f32 to vector<4x32xf32>
    %250 = arith.subf %249, %248 : vector<4x32xf32>
    %251 = arith.mulf %250, %27 : vector<4x32xf32>
    %252 = arith.truncf %251 : vector<4x32xf32> to vector<4x32xbf16>
    %cst_88 = arith.constant dense<0.000000e+00> : vector<4x16xf32>
    %253 = tpu.matmul %252, %21, %cst_88 {dimension_numbers = #tpu.dot_dimension_numbers<[1], [0], [0], [1], [0, 0, 1, 1], [], []>} : vector<4x32xbf16>, vector<32x16xbf16>, vector<4x16xf32> -> vector<4x16xf32>
    %cst_89 = arith.constant 2.000000e+00 : f32
    %254 = vector.broadcast %cst_89 : f32 to vector<4x16xf32>
    %255 = arith.mulf %254, %227 : vector<4x16xf32>
    %256 = arith.addf %214, %255 : vector<4x16xf32>
    %cst_90 = arith.constant 2.000000e+00 : f32
    %257 = vector.broadcast %cst_90 : f32 to vector<4x16xf32>
    %258 = arith.mulf %257, %240 : vector<4x16xf32>
    %259 = arith.addf %256, %258 : vector<4x16xf32>
    %260 = arith.addf %259, %253 : vector<4x16xf32>
    %cst_91 = arith.constant 0.0416666679 : f32
    %261 = vector.broadcast %cst_91 : f32 to vector<4x16xf32>
    %262 = arith.mulf %261, %260 : vector<4x16xf32>
    %263 = arith.addf %204, %262 : vector<4x16xf32>
    %c0_92 = arith.constant 0 : index
    %c0_93 = arith.constant 0 : index
    %264 = vector.load %arg27[%c0_92, %c0_93] : memref<4x16xf32, #tpu.memory_space<vmem>>, vector<4x16xf32>
    tpu.vector_store %arg27[%c0_92, %c0_93], %263 {strides = array<i32>} : memref<4x16xf32, #tpu.memory_space<vmem>>, vector<4x16xf32>,
    %c0_94 = arith.constant 0 : index
    %c0_95 = arith.constant 0 : index
    %265 = vector.load %arg15[%c0_94, %c0_95] : memref<16x32xf32, #tpu.memory_space<vmem>>, vector<16x32xf32>
    %266 = arith.truncf %265 : vector<16x32xf32> to vector<16x32xbf16>
    %267 = arith.truncf %263 : vector<4x16xf32> to vector<4x16xbf16>
    %cst_96 = arith.constant dense<0.000000e+00> : vector<4x32xf32>
    %268 = tpu.matmul %267, %266, %cst_96 {dimension_numbers = #tpu.dot_dimension_numbers<[1], [0], [0], [1], [0, 0, 1, 1], [], []>} : vector<4x16xbf16>, vector<16x32xbf16>, vector<4x32xf32> -> vector<4x32xf32>
    %c0_97 = arith.constant 0 : index
    %c0_98 = arith.constant 0 : index
    %269 = vector.load %arg16[%c0_97, %c0_98] : memref<1x32xf32, #tpu.memory_space<vmem>>, vector<1x32xf32>
    %270 = vector.broadcast %269 : vector<1x32xf32> to vector<4x32xf32>
    %271 = arith.addf %268, %270 : vector<4x32xf32>
    %272 = math.tanh %271 : vector<4x32xf32>
    %c0_99 = arith.constant 0 : index
    %c0_100 = arith.constant 0 : index
    %273 = vector.load %arg17[%c0_99, %c0_100] : memref<32x8xf32, #tpu.memory_space<vmem>>, vector<32x8xf32>
    %274 = arith.truncf %273 : vector<32x8xf32> to vector<32x8xbf16>
    %275 = arith.truncf %272 : vector<4x32xf32> to vector<4x32xbf16>
    %cst_101 = arith.constant dense<0.000000e+00> : vector<4x8xf32>
    %276 = tpu.matmul %275, %274, %cst_101 {dimension_numbers = #tpu.dot_dimension_numbers<[1], [0], [0], [1], [0, 0, 1, 1], [], []>} : vector<4x32xbf16>, vector<32x8xbf16>, vector<4x8xf32> -> vector<4x8xf32>
    %c0_102 = arith.constant 0 : index
    %c0_103 = arith.constant 0 : index
    %277 = vector.load %arg18[%c0_102, %c0_103] : memref<1x8xf32, #tpu.memory_space<vmem>>, vector<1x8xf32>
    %278 = vector.broadcast %277 : vector<1x8xf32> to vector<4x8xf32>
    %279 = arith.addf %276, %278 : vector<4x8xf32>
    %c0_104 = arith.constant 0 : index
    %c0_105 = arith.constant 0 : index
    %280 = vector.load %arg19[%c0_104, %c0_105] : memref<32x8xf32, #tpu.memory_space<vmem>>, vector<32x8xf32>
    %281 = arith.truncf %280 : vector<32x8xf32> to vector<32x8xbf16>
    %282 = arith.truncf %272 : vector<4x32xf32> to vector<4x32xbf16>
    %cst_106 = arith.constant dense<0.000000e+00> : vector<4x8xf32>
    %283 = tpu.matmul %282, %281, %cst_106 {dimension_numbers = #tpu.dot_dimension_numbers<[1], [0], [0], [1], [0, 0, 1, 1], [], []>} : vector<4x32xbf16>, vector<32x8xbf16>, vector<4x8xf32> -> vector<4x8xf32>
    %c0_107 = arith.constant 0 : index
    %c0_108 = arith.constant 0 : index
    %284 = vector.load %arg20[%c0_107, %c0_108] : memref<1x8xf32, #tpu.memory_space<vmem>>, vector<1x8xf32>
    %285 = vector.broadcast %284 : vector<1x8xf32> to vector<4x8xf32>
    %286 = arith.addf %283, %285 : vector<4x8xf32>
    %c0_109 = arith.constant 0 : index
    %c0_110 = arith.constant 0 : index
    %287 = vector.load %arg29[%c0_109, %c0_110] : memref<4x8xf32, #tpu.memory_space<vmem>>, vector<4x8xf32>
    tpu.vector_store %arg29[%c0_109, %c0_110], %279 {strides = array<i32>} : memref<4x8xf32, #tpu.memory_space<vmem>>, vector<4x8xf32>,
    %c0_111 = arith.constant 0 : index
    %c0_112 = arith.constant 0 : index
    %288 = vector.load %arg30[%c0_111, %c0_112] : memref<4x8xf32, #tpu.memory_space<vmem>>, vector<4x8xf32>
    tpu.vector_store %arg30[%c0_111, %c0_112], %286 {strides = array<i32>} : memref<4x8xf32, #tpu.memory_space<vmem>>, vector<4x8xf32>,
    %c0_113 = arith.constant 0 : index
    %c0_114 = arith.constant 0 : index
    %289 = vector.load %arg2[%c0_113, %c0_114] : memref<4x8xf32, #tpu.memory_space<vmem>>, vector<4x8xf32>
    %cst_115 = arith.constant 5.000000e-01 : f32
    %290 = vector.broadcast %cst_115 : f32 to vector<4x8xf32>
    %291 = arith.mulf %290, %286 : vector<4x8xf32>
    %292 = math.exp %291 : vector<4x8xf32>
    %293 = arith.mulf %289, %292 : vector<4x8xf32>
    %294 = arith.addf %279, %293 : vector<4x8xf32>
    %c0_116 = arith.constant 0 : index
    %c0_117 = arith.constant 0 : index
    %295 = vector.load %arg21[%c0_116, %c0_117] : memref<8x32xf32, #tpu.memory_space<vmem>>, vector<8x32xf32>
    %296 = arith.truncf %295 : vector<8x32xf32> to vector<8x32xbf16>
    %297 = arith.truncf %294 : vector<4x8xf32> to vector<4x8xbf16>
    %cst_118 = arith.constant dense<0.000000e+00> : vector<4x32xf32>
    %298 = tpu.matmul %297, %296, %cst_118 {dimension_numbers = #tpu.dot_dimension_numbers<[1], [0], [0], [1], [0, 0, 1, 1], [], []>} : vector<4x8xbf16>, vector<8x32xbf16>, vector<4x32xf32> -> vector<4x32xf32>
    %c0_119 = arith.constant 0 : index
    %c0_120 = arith.constant 0 : index
    %299 = vector.load %arg22[%c0_119, %c0_120] : memref<1x32xf32, #tpu.memory_space<vmem>>, vector<1x32xf32>
    %300 = vector.broadcast %299 : vector<1x32xf32> to vector<4x32xf32>
    %301 = arith.addf %298, %300 : vector<4x32xf32>
    %302 = math.tanh %301 : vector<4x32xf32>
    %c0_121 = arith.constant 0 : index
    %c0_122 = arith.constant 0 : index
    %303 = vector.load %arg23[%c0_121, %c0_122] : memref<32x16xf32, #tpu.memory_space<vmem>>, vector<32x16xf32>
    %304 = arith.truncf %303 : vector<32x16xf32> to vector<32x16xbf16>
    %305 = arith.truncf %302 : vector<4x32xf32> to vector<4x32xbf16>
    %cst_123 = arith.constant dense<0.000000e+00> : vector<4x16xf32>
    %306 = tpu.matmul %305, %304, %cst_123 {dimension_numbers = #tpu.dot_dimension_numbers<[1], [0], [0], [1], [0, 0, 1, 1], [], []>} : vector<4x32xbf16>, vector<32x16xbf16>, vector<4x16xf32> -> vector<4x16xf32>
    %c0_124 = arith.constant 0 : index
    %c0_125 = arith.constant 0 : index
    %307 = vector.load %arg24[%c0_124, %c0_125] : memref<1x16xf32, #tpu.memory_space<vmem>>, vector<1x16xf32>
    %308 = vector.broadcast %307 : vector<1x16xf32> to vector<4x16xf32>
    %309 = arith.addf %306, %308 : vector<4x16xf32>
    %c0_126 = arith.constant 0 : index
    %c0_127 = arith.constant 0 : index
    %310 = vector.load %arg28[%c0_126, %c0_127] : memref<4x16xf32, #tpu.memory_space<vmem>>, vector<4x16xf32>
    tpu.vector_store %arg28[%c0_126, %c0_127], %309 {strides = array<i32>} : memref<4x16xf32, #tpu.memory_space<vmem>>, vector<4x16xf32>,
    %c0_128 = arith.constant 0 : index
    %c0_129 = arith.constant 0 : index
    %311 = vector.load %arg11[%c0_128, %c0_129] : memref<16x32xf32, #tpu.memory_space<vmem>>, vector<16x32xf32>
    %312 = arith.truncf %311 : vector<16x32xf32> to vector<16x32xbf16>
    %c0_130 = arith.constant 0 : index
    %c0_131 = arith.constant 0 : index
    %313 = vector.load %arg14[%c0_130, %c0_131] : memref<32x16xf32, #tpu.memory_space<vmem>>, vector<32x16xf32>
    %314 = arith.truncf %313 : vector<32x16xf32> to vector<32x16xbf16>
    %c0_132 = arith.constant 0 : index
    %c0_133 = arith.constant 0 : index
    %315 = vector.load %arg12[%c0_132, %c0_133] : memref<1x32xf32, #tpu.memory_space<vmem>>, vector<1x32xf32>
    %316 = vector.shape_cast %315 : vector<1x32xf32> to vector<1x32xf32>
    %317 = vector.broadcast %316 : vector<1x32xf32> to vector<4x32xf32>
    %c0_134 = arith.constant 0 : index
    %c0_135 = arith.constant 0 : index
    %318 = vector.load %arg13[%c0_134, %c0_135] : memref<1x32xf32, #tpu.memory_space<vmem>>, vector<1x32xf32>
    %319 = vector.shape_cast %318 : vector<1x32xf32> to vector<1x32xf32>
    %320 = vector.broadcast %319 : vector<1x32xf32> to vector<4x32xf32>
    %c0_i32_136 = arith.constant 0 : i32
    %321 = arith.truncf %309 : vector<4x16xf32> to vector<4x16xbf16>
    %cst_137 = arith.constant dense<0.000000e+00> : vector<4x32xf32>
    %322 = tpu.matmul %321, %312, %cst_137 {dimension_numbers = #tpu.dot_dimension_numbers<[1], [0], [0], [1], [0, 0, 1, 1], [], []>} : vector<4x16xbf16>, vector<16x32xbf16>, vector<4x32xf32> -> vector<4x32xf32>
    %323 = arith.addf %322, %317 : vector<4x32xf32>
    %324 = math.tanh %323 : vector<4x32xf32>
    %325 = arith.mulf %324, %324 : vector<4x32xf32>
    %cst_138 = arith.constant 1.000000e+00 : f32
    %326 = vector.broadcast %cst_138 : f32 to vector<4x32xf32>
    %327 = arith.subf %326, %325 : vector<4x32xf32>
    %328 = arith.mulf %327, %320 : vector<4x32xf32>
    %329 = arith.truncf %328 : vector<4x32xf32> to vector<4x32xbf16>
    %cst_139 = arith.constant dense<0.000000e+00> : vector<4x16xf32>
    %330 = tpu.matmul %329, %314, %cst_139 {dimension_numbers = #tpu.dot_dimension_numbers<[1], [0], [0], [1], [0, 0, 1, 1], [], []>} : vector<4x32xbf16>, vector<32x16xbf16>, vector<4x16xf32> -> vector<4x16xf32>
    %cst_140 = arith.constant 1.250000e-01 : f32
    %331 = vector.broadcast %cst_140 : f32 to vector<4x16xf32>
    %332 = arith.mulf %331, %330 : vector<4x16xf32>
    %333 = arith.addf %309, %332 : vector<4x16xf32>
    %334 = arith.truncf %333 : vector<4x16xf32> to vector<4x16xbf16>
    %cst_141 = arith.constant dense<0.000000e+00> : vector<4x32xf32>
    %335 = tpu.matmul %334, %312, %cst_141 {dimension_numbers = #tpu.dot_dimension_numbers<[1], [0], [0], [1], [0, 0, 1, 1], [], []>} : vector<4x16xbf16>, vector<16x32xbf16>, vector<4x32xf32> -> vector<4x32xf32>
    %336 = arith.addf %335, %317 : vector<4x32xf32>
    %337 = math.tanh %336 : vector<4x32xf32>
    %338 = arith.mulf %337, %337 : vector<4x32xf32>
    %cst_142 = arith.constant 1.000000e+00 : f32
    %339 = vector.broadcast %cst_142 : f32 to vector<4x32xf32>
    %340 = arith.subf %339, %338 : vector<4x32xf32>
    %341 = arith.mulf %340, %320 : vector<4x32xf32>
    %342 = arith.truncf %341 : vector<4x32xf32> to vector<4x32xbf16>
    %cst_143 = arith.constant dense<0.000000e+00> : vector<4x16xf32>
    %343 = tpu.matmul %342, %314, %cst_143 {dimension_numbers = #tpu.dot_dimension_numbers<[1], [0], [0], [1], [0, 0, 1, 1], [], []>} : vector<4x32xbf16>, vector<32x16xbf16>, vector<4x16xf32> -> vector<4x16xf32>
    %cst_144 = arith.constant 1.250000e-01 : f32
    %344 = vector.broadcast %cst_144 : f32 to vector<4x16xf32>
    %345 = arith.mulf %344, %343 : vector<4x16xf32>
    %346 = arith.addf %309, %345 : vector<4x16xf32>
    %347 = arith.truncf %346 : vector<4x16xf32> to vector<4x16xbf16>
    %cst_145 = arith.constant dense<0.000000e+00> : vector<4x32xf32>
    %348 = tpu.matmul %347, %312, %cst_145 {dimension_numbers = #tpu.dot_dimension_numbers<[1], [0], [0], [1], [0, 0, 1, 1], [], []>} : vector<4x16xbf16>, vector<16x32xbf16>, vector<4x32xf32> -> vector<4x32xf32>
    %349 = arith.addf %348, %317 : vector<4x32xf32>
    %350 = math.tanh %349 : vector<4x32xf32>
    %351 = arith.mulf %350, %350 : vector<4x32xf32>
    %cst_146 = arith.constant 1.000000e+00 : f32
    %352 = vector.broadcast %cst_146 : f32 to vector<4x32xf32>
    %353 = arith.subf %352, %351 : vector<4x32xf32>
    %354 = arith.mulf %353, %320 : vector<4x32xf32>
    %355 = arith.truncf %354 : vector<4x32xf32> to vector<4x32xbf16>
    %cst_147 = arith.constant dense<0.000000e+00> : vector<4x16xf32>
    %356 = tpu.matmul %355, %314, %cst_147 {dimension_numbers = #tpu.dot_dimension_numbers<[1], [0], [0], [1], [0, 0, 1, 1], [], []>} : vector<4x32xbf16>, vector<32x16xbf16>, vector<4x16xf32> -> vector<4x16xf32>
    %cst_148 = arith.constant 2.500000e-01 : f32
    %357 = vector.broadcast %cst_148 : f32 to vector<4x16xf32>
    %358 = arith.mulf %357, %356 : vector<4x16xf32>
    %359 = arith.addf %309, %358 : vector<4x16xf32>
    %360 = arith.truncf %359 : vector<4x16xf32> to vector<4x16xbf16>
    %cst_149 = arith.constant dense<0.000000e+00> : vector<4x32xf32>
    %361 = tpu.matmul %360, %312, %cst_149 {dimension_numbers = #tpu.dot_dimension_numbers<[1], [0], [0], [1], [0, 0, 1, 1], [], []>} : vector<4x16xbf16>, vector<16x32xbf16>, vector<4x32xf32> -> vector<4x32xf32>
    %362 = arith.addf %361, %317 : vector<4x32xf32>
    %363 = math.tanh %362 : vector<4x32xf32>
    %364 = arith.mulf %363, %363 : vector<4x32xf32>
    %cst_150 = arith.constant 1.000000e+00 : f32
    %365 = vector.broadcast %cst_150 : f32 to vector<4x32xf32>
    %366 = arith.subf %365, %364 : vector<4x32xf32>
    %367 = arith.mulf %366, %320 : vector<4x32xf32>
    %368 = arith.truncf %367 : vector<4x32xf32> to vector<4x32xbf16>
    %cst_151 = arith.constant dense<0.000000e+00> : vector<4x16xf32>
    %369 = tpu.matmul %368, %314, %cst_151 {dimension_numbers = #tpu.dot_dimension_numbers<[1], [0], [0], [1], [0, 0, 1, 1], [], []>} : vector<4x32xbf16>, vector<32x16xbf16>, vector<4x16xf32> -> vector<4x16xf32>
    %cst_152 = arith.constant 2.000000e+00 : f32
    %370 = vector.broadcast %cst_152 : f32 to vector<4x16xf32>
    %371 = arith.mulf %370, %343 : vector<4x16xf32>
    %372 = arith.addf %330, %371 : vector<4x16xf32>
    %cst_153 = arith.constant 2.000000e+00 : f32
    %373 = vector.broadcast %cst_153 : f32 to vector<4x16xf32>
    %374 = arith.mulf %373, %356 : vector<4x16xf32>
    %375 = arith.addf %372, %374 : vector<4x16xf32>
    %376 = arith.addf %375, %369 : vector<4x16xf32>
    %cst_154 = arith.constant 0.0416666679 : f32
    %377 = vector.broadcast %cst_154 : f32 to vector<4x16xf32>
    %378 = arith.mulf %377, %376 : vector<4x16xf32>
    %379 = arith.addf %309, %378 : vector<4x16xf32>
    %c1_i32_155 = arith.constant 1 : i32
    %380 = arith.truncf %379 : vector<4x16xf32> to vector<4x16xbf16>
    %cst_156 = arith.constant dense<0.000000e+00> : vector<4x32xf32>
    %381 = tpu.matmul %380, %312, %cst_156 {dimension_numbers = #tpu.dot_dimension_numbers<[1], [0], [0], [1], [0, 0, 1, 1], [], []>} : vector<4x16xbf16>, vector<16x32xbf16>, vector<4x32xf32> -> vector<4x32xf32>
    %382 = arith.addf %381, %317 : vector<4x32xf32>
    %383 = math.tanh %382 : vector<4x32xf32>
    %384 = arith.mulf %383, %383 : vector<4x32xf32>
    %cst_157 = arith.constant 1.000000e+00 : f32
    %385 = vector.broadcast %cst_157 : f32 to vector<4x32xf32>
    %386 = arith.subf %385, %384 : vector<4x32xf32>
    %387 = arith.mulf %386, %320 : vector<4x32xf32>
    %388 = arith.truncf %387 : vector<4x32xf32> to vector<4x32xbf16>
    %cst_158 = arith.constant dense<0.000000e+00> : vector<4x16xf32>
    %389 = tpu.matmul %388, %314, %cst_158 {dimension_numbers = #tpu.dot_dimension_numbers<[1], [0], [0], [1], [0, 0, 1, 1], [], []>} : vector<4x32xbf16>, vector<32x16xbf16>, vector<4x16xf32> -> vector<4x16xf32>
    %cst_159 = arith.constant 1.250000e-01 : f32
    %390 = vector.broadcast %cst_159 : f32 to vector<4x16xf32>
    %391 = arith.mulf %390, %389 : vector<4x16xf32>
    %392 = arith.addf %379, %391 : vector<4x16xf32>
    %393 = arith.truncf %392 : vector<4x16xf32> to vector<4x16xbf16>
    %cst_160 = arith.constant dense<0.000000e+00> : vector<4x32xf32>
    %394 = tpu.matmul %393, %312, %cst_160 {dimension_numbers = #tpu.dot_dimension_numbers<[1], [0], [0], [1], [0, 0, 1, 1], [], []>} : vector<4x16xbf16>, vector<16x32xbf16>, vector<4x32xf32> -> vector<4x32xf32>
    %395 = arith.addf %394, %317 : vector<4x32xf32>
    %396 = math.tanh %395 : vector<4x32xf32>
    %397 = arith.mulf %396, %396 : vector<4x32xf32>
    %cst_161 = arith.constant 1.000000e+00 : f32
    %398 = vector.broadcast %cst_161 : f32 to vector<4x32xf32>
    %399 = arith.subf %398, %397 : vector<4x32xf32>
    %400 = arith.mulf %399, %320 : vector<4x32xf32>
    %401 = arith.truncf %400 : vector<4x32xf32> to vector<4x32xbf16>
    %cst_162 = arith.constant dense<0.000000e+00> : vector<4x16xf32>
    %402 = tpu.matmul %401, %314, %cst_162 {dimension_numbers = #tpu.dot_dimension_numbers<[1], [0], [0], [1], [0, 0, 1, 1], [], []>} : vector<4x32xbf16>, vector<32x16xbf16>, vector<4x16xf32> -> vector<4x16xf32>
    %cst_163 = arith.constant 1.250000e-01 : f32
    %403 = vector.broadcast %cst_163 : f32 to vector<4x16xf32>
    %404 = arith.mulf %403, %402 : vector<4x16xf32>
    %405 = arith.addf %379, %404 : vector<4x16xf32>
    %406 = arith.truncf %405 : vector<4x16xf32> to vector<4x16xbf16>
    %cst_164 = arith.constant dense<0.000000e+00> : vector<4x32xf32>
    %407 = tpu.matmul %406, %312, %cst_164 {dimension_numbers = #tpu.dot_dimension_numbers<[1], [0], [0], [1], [0, 0, 1, 1], [], []>} : vector<4x16xbf16>, vector<16x32xbf16>, vector<4x32xf32> -> vector<4x32xf32>
    %408 = arith.addf %407, %317 : vector<4x32xf32>
    %409 = math.tanh %408 : vector<4x32xf32>
    %410 = arith.mulf %409, %409 : vector<4x32xf32>
    %cst_165 = arith.constant 1.000000e+00 : f32
    %411 = vector.broadcast %cst_165 : f32 to vector<4x32xf32>
    %412 = arith.subf %411, %410 : vector<4x32xf32>
    %413 = arith.mulf %412, %320 : vector<4x32xf32>
    %414 = arith.truncf %413 : vector<4x32xf32> to vector<4x32xbf16>
    %cst_166 = arith.constant dense<0.000000e+00> : vector<4x16xf32>
    %415 = tpu.matmul %414, %314, %cst_166 {dimension_numbers = #tpu.dot_dimension_numbers<[1], [0], [0], [1], [0, 0, 1, 1], [], []>} : vector<4x32xbf16>, vector<32x16xbf16>, vector<4x16xf32> -> vector<4x16xf32>
    %cst_167 = arith.constant 2.500000e-01 : f32
    %416 = vector.broadcast %cst_167 : f32 to vector<4x16xf32>
    %417 = arith.mulf %416, %415 : vector<4x16xf32>
    %418 = arith.addf %379, %417 : vector<4x16xf32>
    %419 = arith.truncf %418 : vector<4x16xf32> to vector<4x16xbf16>
    %cst_168 = arith.constant dense<0.000000e+00> : vector<4x32xf32>
    %420 = tpu.matmul %419, %312, %cst_168 {dimension_numbers = #tpu.dot_dimension_numbers<[1], [0], [0], [1], [0, 0, 1, 1], [], []>} : vector<4x16xbf16>, vector<16x32xbf16>, vector<4x32xf32> -> vector<4x32xf32>
    %421 = arith.addf %420, %317 : vector<4x32xf32>
    %422 = math.tanh %421 : vector<4x32xf32>
    %423 = arith.mulf %422, %422 : vector<4x32xf32>
    %cst_169 = arith.constant 1.000000e+00 : f32
    %424 = vector.broadcast %cst_169 : f32 to vector<4x32xf32>
    %425 = arith.subf %424, %423 : vector<4x32xf32>
    %426 = arith.mulf %425, %320 : vector<4x32xf32>
    %427 = arith.truncf %426 : vector<4x32xf32> to vector<4x32xbf16>
    %cst_170 = arith.constant dense<0.000000e+00> : vector<4x16xf32>
    %428 = tpu.matmul %427, %314, %cst_170 {dimension_numbers = #tpu.dot_dimension_numbers<[1], [0], [0], [1], [0, 0, 1, 1], [], []>} : vector<4x32xbf16>, vector<32x16xbf16>, vector<4x16xf32> -> vector<4x16xf32>
    %cst_171 = arith.constant 2.000000e+00 : f32
    %429 = vector.broadcast %cst_171 : f32 to vector<4x16xf32>
    %430 = arith.mulf %429, %402 : vector<4x16xf32>
    %431 = arith.addf %389, %430 : vector<4x16xf32>
    %cst_172 = arith.constant 2.000000e+00 : f32
    %432 = vector.broadcast %cst_172 : f32 to vector<4x16xf32>
    %433 = arith.mulf %432, %415 : vector<4x16xf32>
    %434 = arith.addf %431, %433 : vector<4x16xf32>
    %435 = arith.addf %434, %428 : vector<4x16xf32>
    %cst_173 = arith.constant 0.0416666679 : f32
    %436 = vector.broadcast %cst_173 : f32 to vector<4x16xf32>
    %437 = arith.mulf %436, %435 : vector<4x16xf32>
    %438 = arith.addf %379, %437 : vector<4x16xf32>
    %c2_i32_174 = arith.constant 2 : i32
    %439 = arith.truncf %438 : vector<4x16xf32> to vector<4x16xbf16>
    %cst_175 = arith.constant dense<0.000000e+00> : vector<4x32xf32>
    %440 = tpu.matmul %439, %312, %cst_175 {dimension_numbers = #tpu.dot_dimension_numbers<[1], [0], [0], [1], [0, 0, 1, 1], [], []>} : vector<4x16xbf16>, vector<16x32xbf16>, vector<4x32xf32> -> vector<4x32xf32>
    %441 = arith.addf %440, %317 : vector<4x32xf32>
    %442 = math.tanh %441 : vector<4x32xf32>
    %443 = arith.mulf %442, %442 : vector<4x32xf32>
    %cst_176 = arith.constant 1.000000e+00 : f32
    %444 = vector.broadcast %cst_176 : f32 to vector<4x32xf32>
    %445 = arith.subf %444, %443 : vector<4x32xf32>
    %446 = arith.mulf %445, %320 : vector<4x32xf32>
    %447 = arith.truncf %446 : vector<4x32xf32> to vector<4x32xbf16>
    %cst_177 = arith.constant dense<0.000000e+00> : vector<4x16xf32>
    %448 = tpu.matmul %447, %314, %cst_177 {dimension_numbers = #tpu.dot_dimension_numbers<[1], [0], [0], [1], [0, 0, 1, 1], [], []>} : vector<4x32xbf16>, vector<32x16xbf16>, vector<4x16xf32> -> vector<4x16xf32>
    %cst_178 = arith.constant 1.250000e-01 : f32
    %449 = vector.broadcast %cst_178 : f32 to vector<4x16xf32>
    %450 = arith.mulf %449, %448 : vector<4x16xf32>
    %451 = arith.addf %438, %450 : vector<4x16xf32>
    %452 = arith.truncf %451 : vector<4x16xf32> to vector<4x16xbf16>
    %cst_179 = arith.constant dense<0.000000e+00> : vector<4x32xf32>
    %453 = tpu.matmul %452, %312, %cst_179 {dimension_numbers = #tpu.dot_dimension_numbers<[1], [0], [0], [1], [0, 0, 1, 1], [], []>} : vector<4x16xbf16>, vector<16x32xbf16>, vector<4x32xf32> -> vector<4x32xf32>
    %454 = arith.addf %453, %317 : vector<4x32xf32>
    %455 = math.tanh %454 : vector<4x32xf32>
    %456 = arith.mulf %455, %455 : vector<4x32xf32>
    %cst_180 = arith.constant 1.000000e+00 : f32
    %457 = vector.broadcast %cst_180 : f32 to vector<4x32xf32>
    %458 = arith.subf %457, %456 : vector<4x32xf32>
    %459 = arith.mulf %458, %320 : vector<4x32xf32>
    %460 = arith.truncf %459 : vector<4x32xf32> to vector<4x32xbf16>
    %cst_181 = arith.constant dense<0.000000e+00> : vector<4x16xf32>
    %461 = tpu.matmul %460, %314, %cst_181 {dimension_numbers = #tpu.dot_dimension_numbers<[1], [0], [0], [1], [0, 0, 1, 1], [], []>} : vector<4x32xbf16>, vector<32x16xbf16>, vector<4x16xf32> -> vector<4x16xf32>
    %cst_182 = arith.constant 1.250000e-01 : f32
    %462 = vector.broadcast %cst_182 : f32 to vector<4x16xf32>
    %463 = arith.mulf %462, %461 : vector<4x16xf32>
    %464 = arith.addf %438, %463 : vector<4x16xf32>
    %465 = arith.truncf %464 : vector<4x16xf32> to vector<4x16xbf16>
    %cst_183 = arith.constant dense<0.000000e+00> : vector<4x32xf32>
    %466 = tpu.matmul %465, %312, %cst_183 {dimension_numbers = #tpu.dot_dimension_numbers<[1], [0], [0], [1], [0, 0, 1, 1], [], []>} : vector<4x16xbf16>, vector<16x32xbf16>, vector<4x32xf32> -> vector<4x32xf32>
    %467 = arith.addf %466, %317 : vector<4x32xf32>
    %468 = math.tanh %467 : vector<4x32xf32>
    %469 = arith.mulf %468, %468 : vector<4x32xf32>
    %cst_184 = arith.constant 1.000000e+00 : f32
    %470 = vector.broadcast %cst_184 : f32 to vector<4x32xf32>
    %471 = arith.subf %470, %469 : vector<4x32xf32>
    %472 = arith.mulf %471, %320 : vector<4x32xf32>
    %473 = arith.truncf %472 : vector<4x32xf32> to vector<4x32xbf16>
    %cst_185 = arith.constant dense<0.000000e+00> : vector<4x16xf32>
    %474 = tpu.matmul %473, %314, %cst_185 {dimension_numbers = #tpu.dot_dimension_numbers<[1], [0], [0], [1], [0, 0, 1, 1], [], []>} : vector<4x32xbf16>, vector<32x16xbf16>, vector<4x16xf32> -> vector<4x16xf32>
    %cst_186 = arith.constant 2.500000e-01 : f32
    %475 = vector.broadcast %cst_186 : f32 to vector<4x16xf32>
    %476 = arith.mulf %475, %474 : vector<4x16xf32>
    %477 = arith.addf %438, %476 : vector<4x16xf32>
    %478 = arith.truncf %477 : vector<4x16xf32> to vector<4x16xbf16>
    %cst_187 = arith.constant dense<0.000000e+00> : vector<4x32xf32>
    %479 = tpu.matmul %478, %312, %cst_187 {dimension_numbers = #tpu.dot_dimension_numbers<[1], [0], [0], [1], [0, 0, 1, 1], [], []>} : vector<4x16xbf16>, vector<16x32xbf16>, vector<4x32xf32> -> vector<4x32xf32>
    %480 = arith.addf %479, %317 : vector<4x32xf32>
    %481 = math.tanh %480 : vector<4x32xf32>
    %482 = arith.mulf %481, %481 : vector<4x32xf32>
    %cst_188 = arith.constant 1.000000e+00 : f32
    %483 = vector.broadcast %cst_188 : f32 to vector<4x32xf32>
    %484 = arith.subf %483, %482 : vector<4x32xf32>
    %485 = arith.mulf %484, %320 : vector<4x32xf32>
    %486 = arith.truncf %485 : vector<4x32xf32> to vector<4x32xbf16>
    %cst_189 = arith.constant dense<0.000000e+00> : vector<4x16xf32>
    %487 = tpu.matmul %486, %314, %cst_189 {dimension_numbers = #tpu.dot_dimension_numbers<[1], [0], [0], [1], [0, 0, 1, 1], [], []>} : vector<4x32xbf16>, vector<32x16xbf16>, vector<4x16xf32> -> vector<4x16xf32>
    %cst_190 = arith.constant 2.000000e+00 : f32
    %488 = vector.broadcast %cst_190 : f32 to vector<4x16xf32>
    %489 = arith.mulf %488, %461 : vector<4x16xf32>
    %490 = arith.addf %448, %489 : vector<4x16xf32>
    %cst_191 = arith.constant 2.000000e+00 : f32
    %491 = vector.broadcast %cst_191 : f32 to vector<4x16xf32>
    %492 = arith.mulf %491, %474 : vector<4x16xf32>
    %493 = arith.addf %490, %492 : vector<4x16xf32>
    %494 = arith.addf %493, %487 : vector<4x16xf32>
    %cst_192 = arith.constant 0.0416666679 : f32
    %495 = vector.broadcast %cst_192 : f32 to vector<4x16xf32>
    %496 = arith.mulf %495, %494 : vector<4x16xf32>
    %497 = arith.addf %438, %496 : vector<4x16xf32>
    %c3_i32_193 = arith.constant 3 : i32
    %498 = arith.truncf %497 : vector<4x16xf32> to vector<4x16xbf16>
    %cst_194 = arith.constant dense<0.000000e+00> : vector<4x32xf32>
    %499 = tpu.matmul %498, %312, %cst_194 {dimension_numbers = #tpu.dot_dimension_numbers<[1], [0], [0], [1], [0, 0, 1, 1], [], []>} : vector<4x16xbf16>, vector<16x32xbf16>, vector<4x32xf32> -> vector<4x32xf32>
    %500 = arith.addf %499, %317 : vector<4x32xf32>
    %501 = math.tanh %500 : vector<4x32xf32>
    %502 = arith.mulf %501, %501 : vector<4x32xf32>
    %cst_195 = arith.constant 1.000000e+00 : f32
    %503 = vector.broadcast %cst_195 : f32 to vector<4x32xf32>
    %504 = arith.subf %503, %502 : vector<4x32xf32>
    %505 = arith.mulf %504, %320 : vector<4x32xf32>
    %506 = arith.truncf %505 : vector<4x32xf32> to vector<4x32xbf16>
    %cst_196 = arith.constant dense<0.000000e+00> : vector<4x16xf32>
    %507 = tpu.matmul %506, %314, %cst_196 {dimension_numbers = #tpu.dot_dimension_numbers<[1], [0], [0], [1], [0, 0, 1, 1], [], []>} : vector<4x32xbf16>, vector<32x16xbf16>, vector<4x16xf32> -> vector<4x16xf32>
    %cst_197 = arith.constant 1.250000e-01 : f32
    %508 = vector.broadcast %cst_197 : f32 to vector<4x16xf32>
    %509 = arith.mulf %508, %507 : vector<4x16xf32>
    %510 = arith.addf %497, %509 : vector<4x16xf32>
    %511 = arith.truncf %510 : vector<4x16xf32> to vector<4x16xbf16>
    %cst_198 = arith.constant dense<0.000000e+00> : vector<4x32xf32>
    %512 = tpu.matmul %511, %312, %cst_198 {dimension_numbers = #tpu.dot_dimension_numbers<[1], [0], [0], [1], [0, 0, 1, 1], [], []>} : vector<4x16xbf16>, vector<16x32xbf16>, vector<4x32xf32> -> vector<4x32xf32>
    %513 = arith.addf %512, %317 : vector<4x32xf32>
    %514 = math.tanh %513 : vector<4x32xf32>
    %515 = arith.mulf %514, %514 : vector<4x32xf32>
    %cst_199 = arith.constant 1.000000e+00 : f32
    %516 = vector.broadcast %cst_199 : f32 to vector<4x32xf32>
    %517 = arith.subf %516, %515 : vector<4x32xf32>
    %518 = arith.mulf %517, %320 : vector<4x32xf32>
    %519 = arith.truncf %518 : vector<4x32xf32> to vector<4x32xbf16>
    %cst_200 = arith.constant dense<0.000000e+00> : vector<4x16xf32>
    %520 = tpu.matmul %519, %314, %cst_200 {dimension_numbers = #tpu.dot_dimension_numbers<[1], [0], [0], [1], [0, 0, 1, 1], [], []>} : vector<4x32xbf16>, vector<32x16xbf16>, vector<4x16xf32> -> vector<4x16xf32>
    %cst_201 = arith.constant 1.250000e-01 : f32
    %521 = vector.broadcast %cst_201 : f32 to vector<4x16xf32>
    %522 = arith.mulf %521, %520 : vector<4x16xf32>
    %523 = arith.addf %497, %522 : vector<4x16xf32>
    %524 = arith.truncf %523 : vector<4x16xf32> to vector<4x16xbf16>
    %cst_202 = arith.constant dense<0.000000e+00> : vector<4x32xf32>
    %525 = tpu.matmul %524, %312, %cst_202 {dimension_numbers = #tpu.dot_dimension_numbers<[1], [0], [0], [1], [0, 0, 1, 1], [], []>} : vector<4x16xbf16>, vector<16x32xbf16>, vector<4x32xf32> -> vector<4x32xf32>
    %526 = arith.addf %525, %317 : vector<4x32xf32>
    %527 = math.tanh %526 : vector<4x32xf32>
    %528 = arith.mulf %527, %527 : vector<4x32xf32>
    %cst_203 = arith.constant 1.000000e+00 : f32
    %529 = vector.broadcast %cst_203 : f32 to vector<4x32xf32>
    %530 = arith.subf %529, %528 : vector<4x32xf32>
    %531 = arith.mulf %530, %320 : vector<4x32xf32>
    %532 = arith.truncf %531 : vector<4x32xf32> to vector<4x32xbf16>
    %cst_204 = arith.constant dense<0.000000e+00> : vector<4x16xf32>
    %533 = tpu.matmul %532, %314, %cst_204 {dimension_numbers = #tpu.dot_dimension_numbers<[1], [0], [0], [1], [0, 0, 1, 1], [], []>} : vector<4x32xbf16>, vector<32x16xbf16>, vector<4x16xf32> -> vector<4x16xf32>
    %cst_205 = arith.constant 2.500000e-01 : f32
    %534 = vector.broadcast %cst_205 : f32 to vector<4x16xf32>
    %535 = arith.mulf %534, %533 : vector<4x16xf32>
    %536 = arith.addf %497, %535 : vector<4x16xf32>
    %537 = arith.truncf %536 : vector<4x16xf32> to vector<4x16xbf16>
    %cst_206 = arith.constant dense<0.000000e+00> : vector<4x32xf32>
    %538 = tpu.matmul %537, %312, %cst_206 {dimension_numbers = #tpu.dot_dimension_numbers<[1], [0], [0], [1], [0, 0, 1, 1], [], []>} : vector<4x16xbf16>, vector<16x32xbf16>, vector<4x32xf32> -> vector<4x32xf32>
    %539 = arith.addf %538, %317 : vector<4x32xf32>
    %540 = math.tanh %539 : vector<4x32xf32>
    %541 = arith.mulf %540, %540 : vector<4x32xf32>
    %cst_207 = arith.constant 1.000000e+00 : f32
    %542 = vector.broadcast %cst_207 : f32 to vector<4x32xf32>
    %543 = arith.subf %542, %541 : vector<4x32xf32>
    %544 = arith.mulf %543, %320 : vector<4x32xf32>
    %545 = arith.truncf %544 : vector<4x32xf32> to vector<4x32xbf16>
    %cst_208 = arith.constant dense<0.000000e+00> : vector<4x16xf32>
    %546 = tpu.matmul %545, %314, %cst_208 {dimension_numbers = #tpu.dot_dimension_numbers<[1], [0], [0], [1], [0, 0, 1, 1], [], []>} : vector<4x32xbf16>, vector<32x16xbf16>, vector<4x16xf32> -> vector<4x16xf32>
    %cst_209 = arith.constant 2.000000e+00 : f32
    %547 = vector.broadcast %cst_209 : f32 to vector<4x16xf32>
    %548 = arith.mulf %547, %520 : vector<4x16xf32>
    %549 = arith.addf %507, %548 : vector<4x16xf32>
    %cst_210 = arith.constant 2.000000e+00 : f32
    %550 = vector.broadcast %cst_210 : f32 to vector<4x16xf32>
    %551 = arith.mulf %550, %533 : vector<4x16xf32>
    %552 = arith.addf %549, %551 : vector<4x16xf32>
    %553 = arith.addf %552, %546 : vector<4x16xf32>
    %cst_211 = arith.constant 0.0416666679 : f32
    %554 = vector.broadcast %cst_211 : f32 to vector<4x16xf32>
    %555 = arith.mulf %554, %553 : vector<4x16xf32>
    %556 = arith.addf %497, %555 : vector<4x16xf32>
    %c0_212 = arith.constant 0 : index
    %c0_213 = arith.constant 0 : index
    %557 = vector.load %arg26[%c0_212, %c0_213] : memref<4x16xf32, #tpu.memory_space<vmem>>, vector<4x16xf32>
    tpu.vector_store %arg26[%c0_212, %c0_213], %556 {strides = array<i32>} : memref<4x16xf32, #tpu.memory_space<vmem>>, vector<4x16xf32>,
    return
  }
  func.func @transform_0(%arg0: i32) -> (i32, i32) {
    %c0_i32 = arith.constant 0 : i32
    %c0_i32_0 = arith.constant 0 : i32
    return %arg0, %c0_i32 : i32, i32
  }
  func.func @transform_1(%arg0: i32) -> (i32, i32) {
    %c0_i32 = arith.constant 0 : i32
    %c0_i32_0 = arith.constant 0 : i32
    return %arg0, %c0_i32 : i32, i32
  }
  func.func @transform_2(%arg0: i32) -> (i32, i32) {
    %c0_i32 = arith.constant 0 : i32
    %c0_i32_0 = arith.constant 0 : i32
    %c0_i32_1 = arith.constant 0 : i32
    return %c0_i32, %c0_i32_0 : i32, i32
  }
  func.func @transform_3(%arg0: i32) -> (i32, i32) {
    %c0_i32 = arith.constant 0 : i32
    %c0_i32_0 = arith.constant 0 : i32
    %c0_i32_1 = arith.constant 0 : i32
    return %c0_i32, %c0_i32_0 : i32, i32
  }
  func.func @transform_4(%arg0: i32) -> (i32, i32) {
    %c0_i32 = arith.constant 0 : i32
    %c0_i32_0 = arith.constant 0 : i32
    %c0_i32_1 = arith.constant 0 : i32
    return %c0_i32, %c0_i32_0 : i32, i32
  }
  func.func @transform_5(%arg0: i32) -> (i32, i32) {
    %c0_i32 = arith.constant 0 : i32
    %c0_i32_0 = arith.constant 0 : i32
    %c0_i32_1 = arith.constant 0 : i32
    return %c0_i32, %c0_i32_0 : i32, i32
  }
  func.func @transform_6(%arg0: i32) -> (i32, i32) {
    %c0_i32 = arith.constant 0 : i32
    %c0_i32_0 = arith.constant 0 : i32
    %c0_i32_1 = arith.constant 0 : i32
    return %c0_i32, %c0_i32_0 : i32, i32
  }
  func.func @transform_7(%arg0: i32) -> (i32, i32) {
    %c0_i32 = arith.constant 0 : i32
    %c0_i32_0 = arith.constant 0 : i32
    %c0_i32_1 = arith.constant 0 : i32
    return %c0_i32, %c0_i32_0 : i32, i32
  }
  func.func @transform_8(%arg0: i32) -> (i32, i32) {
    %c0_i32 = arith.constant 0 : i32
    %c0_i32_0 = arith.constant 0 : i32
    %c0_i32_1 = arith.constant 0 : i32
    return %c0_i32, %c0_i32_0 : i32, i32
  }
  func.func @transform_9(%arg0: i32) -> (i32, i32) {
    %c0_i32 = arith.constant 0 : i32
    %c0_i32_0 = arith.constant 0 : i32
    %c0_i32_1 = arith.constant 0 : i32
    return %c0_i32, %c0_i32_0 : i32, i32
  }
  func.func @transform_10(%arg0: i32) -> (i32, i32) {
    %c0_i32 = arith.constant 0 : i32
    %c0_i32_0 = arith.constant 0 : i32
    %c0_i32_1 = arith.constant 0 : i32
    return %c0_i32, %c0_i32_0 : i32, i32
  }
  func.func @transform_11(%arg0: i32) -> (i32, i32) {
    %c0_i32 = arith.constant 0 : i32
    %c0_i32_0 = arith.constant 0 : i32
    %c0_i32_1 = arith.constant 0 : i32
    return %c0_i32, %c0_i32_0 : i32, i32
  }
  func.func @transform_12(%arg0: i32) -> (i32, i32) {
    %c0_i32 = arith.constant 0 : i32
    %c0_i32_0 = arith.constant 0 : i32
    %c0_i32_1 = arith.constant 0 : i32
    return %c0_i32, %c0_i32_0 : i32, i32
  }
  func.func @transform_13(%arg0: i32) -> (i32, i32) {
    %c0_i32 = arith.constant 0 : i32
    %c0_i32_0 = arith.constant 0 : i32
    %c0_i32_1 = arith.constant 0 : i32
    return %c0_i32, %c0_i32_0 : i32, i32
  }
  func.func @transform_14(%arg0: i32) -> (i32, i32) {
    %c0_i32 = arith.constant 0 : i32
    %c0_i32_0 = arith.constant 0 : i32
    %c0_i32_1 = arith.constant 0 : i32
    return %c0_i32, %c0_i32_0 : i32, i32
  }
  func.func @transform_15(%arg0: i32) -> (i32, i32) {
    %c0_i32 = arith.constant 0 : i32
    %c0_i32_0 = arith.constant 0 : i32
    %c0_i32_1 = arith.constant 0 : i32
    return %c0_i32, %c0_i32_0 : i32, i32
  }
  func.func @transform_16(%arg0: i32) -> (i32, i32) {
    %c0_i32 = arith.constant 0 : i32
    %c0_i32_0 = arith.constant 0 : i32
    %c0_i32_1 = arith.constant 0 : i32
    return %c0_i32, %c0_i32_0 : i32, i32
  }
  func.func @transform_17(%arg0: i32) -> (i32, i32) {
    %c0_i32 = arith.constant 0 : i32
    %c0_i32_0 = arith.constant 0 : i32
    %c0_i32_1 = arith.constant 0 : i32
    return %c0_i32, %c0_i32_0 : i32, i32
  }
  func.func @transform_18(%arg0: i32) -> (i32, i32) {
    %c0_i32 = arith.constant 0 : i32
    %c0_i32_0 = arith.constant 0 : i32
    %c0_i32_1 = arith.constant 0 : i32
    return %c0_i32, %c0_i32_0 : i32, i32
  }
  func.func @transform_19(%arg0: i32) -> (i32, i32) {
    %c0_i32 = arith.constant 0 : i32
    %c0_i32_0 = arith.constant 0 : i32
    %c0_i32_1 = arith.constant 0 : i32
    return %c0_i32, %c0_i32_0 : i32, i32
  }
  func.func @transform_20(%arg0: i32) -> (i32, i32) {
    %c0_i32 = arith.constant 0 : i32
    %c0_i32_0 = arith.constant 0 : i32
    %c0_i32_1 = arith.constant 0 : i32
    return %c0_i32, %c0_i32_0 : i32, i32
  }
  func.func @transform_21(%arg0: i32) -> (i32, i32) {
    %c0_i32 = arith.constant 0 : i32
    %c0_i32_0 = arith.constant 0 : i32
    %c0_i32_1 = arith.constant 0 : i32
    return %c0_i32, %c0_i32_0 : i32, i32
  }
  func.func @transform_22(%arg0: i32) -> (i32, i32) {
    %c0_i32 = arith.constant 0 : i32
    %c0_i32_0 = arith.constant 0 : i32
    %c0_i32_1 = arith.constant 0 : i32
    return %c0_i32, %c0_i32_0 : i32, i32
  }
  func.func @transform_23(%arg0: i32) -> (i32, i32) {
    %c0_i32 = arith.constant 0 : i32
    %c0_i32_0 = arith.constant 0 : i32
    %c0_i32_1 = arith.constant 0 : i32
    return %c0_i32, %c0_i32_0 : i32, i32
  }
  func.func @transform_24(%arg0: i32) -> (i32, i32) {
    %c0_i32 = arith.constant 0 : i32
    %c0_i32_0 = arith.constant 0 : i32
    return %arg0, %c0_i32 : i32, i32
  }
  func.func @transform_25(%arg0: i32) -> (i32, i32) {
    %c0_i32 = arith.constant 0 : i32
    %c0_i32_0 = arith.constant 0 : i32
    return %arg0, %c0_i32 : i32, i32
  }
  func.func @transform_26(%arg0: i32) -> (i32, i32) {
    %c0_i32 = arith.constant 0 : i32
    %c0_i32_0 = arith.constant 0 : i32
    return %arg0, %c0_i32 : i32, i32
  }
  func.func @transform_27(%arg0: i32) -> (i32, i32) {
    %c0_i32 = arith.constant 0 : i32
    %c0_i32_0 = arith.constant 0 : i32
    return %arg0, %c0_i32 : i32, i32
  }
  func.func @transform_28(%arg0: i32) -> (i32, i32) {
    %c0_i32 = arith.constant 0 : i32
    %c0_i32_0 = arith.constant 0 : i32
    return %arg0, %c0_i32 : i32, i32
  }
  func.func @transform_29(%arg0: i32) -> (i32, i32) {
    %c0_i32 = arith.constant 0 : i32
    %c0_i32_0 = arith.constant 0 : i32
    return %arg0, %c0_i32 : i32, i32
  }
}

</mosaic_0001>

<bundles_post_ra>
// kernel: hdvae_forward.1
= control target key start
LH: loop header
LB: loop body
LE: loop exit
PB: predicated region body
PF: predicated region fallthrough
CT: control target
= control target key end

     0   :  { %s2144_s6 = smov 1   ;;  %s2145_s10 = smov 2   ;;  %s2728_s0 = inlined_call_operand.smem [shape: u32[30], index: -1, kind: input, shape index: {}] }
   0x1   :  { %s2188_s5 = sld [smem:[%s2728_s0]]   ;;  %s2146_s14 = smov 3  }
   0x2   :  { %s2193_s9 = sld [smem:[%s2728_s0 + %s2144_s6]]   ;;  %s2147_s18 = smov 4  }
   0x3   :  { %s2198_s13 = sld [smem:[%s2728_s0 + %s2145_s10]]   ;;  %s2148_s22 = smov 5  }
   0x4   :  { %s2203_s17 = sld [smem:[%s2728_s0 + %s2146_s14]]   ;;  %s2149_s26 = smov 6  }
   0x5   :  { %s2208_s21 = sld [smem:[%s2728_s0 + %s2147_s18]]   ;;  %s2150_s30 = smov 7  }
   0x6   :  { %s2213_s25 = sld [smem:[%s2728_s0 + %s2148_s22]]   ;;  %s2151_s4 = smov 8  }
   0x7   :  { %s2218_s29 = sld [smem:[%s2728_s0 + %s2149_s26]]   ;;  %s2152_s10 = smov 9  }
   0x8   :  { %2734 = sst [smem:[#allocation16_spill]] %s2193_s9  ;;  %s2153_s15 = smov 10  }
   0x9   :  { %s2223_s3 = sld [smem:[%s2728_s0 + %s2150_s30]]   ;;  %s2154_s20 = smov 11  }
   0xa   :  { %s2228_s8 = sld [smem:[%s2728_s0 + %s2151_s4]]   ;;  %s2155_s26 = smov 12  }
   0xb   :  { %s2233_s14 = sld [smem:[%s2728_s0 + %s2152_s10]]   ;;  %s2156_s1 = smov 13  }
   0xc   :  { %s2238_s19 = sld [smem:[%s2728_s0 + %s2153_s15]]   ;;  %s2157_s7 = smov 14  }
   0xd   :  { %s2243_s24 = sld [smem:[%s2728_s0 + %s2154_s20]]   ;;  %s2158_s15 = smov 15  }
   0xe   :  { %s2248_s30 = sld [smem:[%s2728_s0 + %s2155_s26]]   ;;  %s2159_s22 = smov 16  }
   0xf   :  { %s2253_s6 = sld [smem:[%s2728_s0 + %s2156_s1]]   ;;  %s2160_s28 = smov 17  }
  0x10   :  { %s2258_s12 = sld [smem:[%s2728_s0 + %s2157_s7]]   ;;  %s2161_s7 = smov 18  }
  0x11   :  { %s2263_s20 = sld [smem:[%s2728_s0 + %s2158_s15]]   ;;  %s2162_s15 = smov 19  }
  0x12   :  { %2735 = sst [smem:[#allocation17_spill]] %s2238_s19 }
  0x13   :  { %2736 = sst [smem:[#allocation18_spill]] %s2243_s24 }
  0x14   :  { %2737 = sst [smem:[#allocation19_spill]] %s2248_s30 }
  0x15   :  { %2738 = sst [smem:[#allocation20_spill]] %s2253_s6 }
  0x16   :  { %s2268_s27 = sld [smem:[%s2728_s0 + %s2159_s22]]   ;;  %s2163_s22 = smov 20  }
  0x17   :  { %s2273_s4 = sld [smem:[%s2728_s0 + %s2160_s28]]   ;;  %s2164_s28 = smov 21  }
  0x18   :  { %s2278_s30 = sld [smem:[%s2728_s0 + %s2161_s7]]   ;;  %s2165_s7 = smov 22  }
  0x19   :  { %s2283_s24 = sld [smem:[%s2728_s0 + %s2162_s15]]   ;;  %s2166_s15 = smov 23  }
  0x1a   :  { %s2288_s6 = sld [smem:[%s2728_s0 + %s2163_s22]]   ;;  %s2167_s22 = smov 24  }
  0x1b   :  { %s2293_s19 = sld [smem:[%s2728_s0 + %s2164_s28]]   ;;  %s2168_s28 = smov 25  }
  0x1c   :  { %s2298_s9 = sld [smem:[%s2728_s0 + %s2165_s7]]   ;;  %s2169_s7 = smov 26  }
  0x1d   :  { %2739 = sst [smem:[#allocation21_spill]] %s2273_s4 }
  0x1e   :  { %s2303_s4 = sld [smem:[%s2728_s0 + %s2166_s15]]   ;;  %s2170_s15 = smov 27  }
  0x1f   :  { %2740 = sst [smem:[#allocation22_spill]] %s2283_s24 }
  0x20   :  { %s2308_s24 = sld [smem:[%s2728_s0 + %s2167_s22]]   ;;  %s2171_s22 = smov 28  }
  0x21   :  { %2741 = sst [smem:[#allocation23_spill]] %s2293_s19 }
  0x22   :  { %2742 = sst [smem:[#allocation24_spill]] %s2298_s9 }
  0x23   :  { %s2313_s19 = sld [smem:[%s2728_s0 + %s2168_s28]]   ;;  %s2172_s28 = smov 29  }
  0x24   :  { %2743 = sst [smem:[#allocation25_spill]] %s2303_s4 }
  0x25   :  { %s2318_s9 = sld [smem:[%s2728_s0 + %s2169_s7]]  }
  0x26   :  { %2744 = sst [smem:[#allocation26_spill]] %s2308_s24 }
  0x27   :  { %s2323_s4 = sld [smem:[%s2728_s0 + %s2170_s15]]  }
  0x28   :  { %s2328_s24 = sld [smem:[%s2728_s0 + %s2171_s22]]  }
  0x29   :  { %2745 = sst [smem:[#allocation27_spill]] %s2313_s19 }
  0x2a   :  { %s2333_s19 = sld [smem:[%s2728_s0 + %s2172_s28]]  }
  0x2b   :  { %65 = vsyncpa [#allocation3], 0 }
  0x2c   :  { %66 = vsyncpa [#allocation5], 0 }
  0x2d   :  { %67 = vsyncpa [#allocation8], 0  ;;  %v119_v0 = vld [vmem:[%s2198_s13] sm:$0xff]  ;;  %vm130_vm0 = vcmask 1043456   ;;  %vm126_vm1 = vcmask 64512  }
  0x2e   :  { %v118_v1 = vld [vmem:[%s2188_s5] sm:$0xf]  ;;  %v120_v2 = vpack.c.bf16 %v119_v0, %v119_v0 }
  0x2f   :  { %v121_v4 = vpack.c.bf16 %v118_v1, %v118_v1 }
  0x30   :  { %v132_v3 = vsel %vm130_vm0, %v120_v2, 0 }
  0x31   :  { %141 = vmatpush.bf16.msra.mxu0 %v132_v3 }
  0x32   :  { %68 = vsyncpa [#allocation11], 0  ;;  %v150_v5 = vld [vmem:[%s2208_s21 + $0x10] sm:$0xff]  ;;  %v151_v6 = vld [vmem:[%s2208_s21 + $0x18] sm:$0xff]  ;;  %vm159_vm2 = vcmask 261120   ;;  %s2173_s0 = smov 8  }
  0x33   :  { %v153_v7 = vpack.c.bf16 %v151_v6, %v150_v5  ;;  %v148_v8 = vld [vmem:[%s2208_s21] sm:$0xff]  ;;  %v149_v9 = vld [vmem:[%s2208_s21 + $0x8] sm:$0xff]  ;;  %vm181_vm3 = vcmask 125952   ;;  %vm201_vm4 = vcmask 130048   ;;  %v188_v27 = vld [vmem:[%s2233_s14 + $0x10] sm:$0xff]  ;;  %s2746_s5 = sld [smem:[#allocation24_spill]] }
  0x34   :  { %1802 = vmatmul.msk.bf16.vlgmr.msra.gmra.mxu0 %vm126_vm1, %v121_v4  ;;  %v152_v10 = vpack.c.bf16 %v149_v9, %v148_v8  ;;  %v1909_v11 = vld [vmem:[%s2203_s17] ss:$0 sm:$0xff]  ;;  %v184_v22 = vld [vmem:[%s2218_s29 + $0x8] sm:$0xff]  ;;  %v189_v28 = vld [vmem:[%s2233_s14 + $0x18] sm:$0xff]  ;;  %s2747_s13 = sld [smem:[#allocation22_spill]]  ;;  %vm937_vm5 = vcmask 60416  }
  0x35   :  { %169 = vmatpush.bf16.msra.mxu1 %v153_v7  ;;  %v1910_v17 = vld [vmem:[%s2213_s25] ss:$0 sm:$0xff]  ;;  %v2365_v29 = vpack.c.bf16 %v189_v28, %v188_v27  ;;  %v187_v31 = vld [vmem:[%s2233_s14 + $0x8] sm:$0xff]  ;;  %s2748_s17 = sld [smem:[#allocation21_spill]]  ;;  %s2008_s10 = scalar_lea.hbm %s2323_s4, 4 }
  0x36   :  { %v183_v21 = vld [vmem:[%s2218_s29] sm:$0xff]  ;;  %s2749_s21 = sld [smem:[#allocation16_spill]] }
  0x37   :  { %v2348_v23 = vpack.c.bf16 %v184_v22, %v183_v21  ;;  %232 = vmatpush.bf16.msra.mxu3 %v2365_v29  ;;  %v186_v30 = vld [vmem:[%s2233_s14] sm:$0xff]  ;;  %s2750_s25 = sld [smem:[#allocation17_spill]] }
  0x38   :  { %v2371_v32 = vpack.c.bf16 %v187_v31, %v186_v30  ;;  %v2380_v33 = vld [vmem:[%s2223_s3] ss:$0 sm:$0xff]  ;;  %s2751_s29 = sld [smem:[#allocation23_spill]] }
  0x39   :  { %170 = vmatpush.bf16.msra.mxu1 %v152_v10  ;;  %212 = vmatpush.bf16.msra.mxu2 %v2348_v23  ;;  %v2384_v39 = vld [vmem:[%s2228_s8] ss:$0 sm:$0xff]  ;;  %s2752_s3 = sld [smem:[#allocation25_spill]] }
  0x3a   :  { %252 = vmatpush.bf16.msrb.mxu0 %v2348_v23  ;;  %s2753_s8 = sld [smem:[#allocation20_spill]] }
  0x3b   :  { %233 = vmatpush.bf16.msra.mxu3 %v2371_v32  ;;  %s2754_s14 = sld [smem:[#allocation18_spill]] }
  0x3d   :  { %292 = vmatpush.bf16.msrb.mxu1 %v2348_v23  ;;  %272 = vmatpush.bf16.msrb.mxu2 %v2365_v29 }
  0x3e   :  { %332 = vmatpush.bf16.msra.mxu0 %v2348_v23 }
  0x3f   :  { %312 = vmatpush.bf16.msrb.mxu3 %v2365_v29 }
  0x41   :  { %273 = vmatpush.bf16.msrb.mxu2 %v2371_v32 }
  0x43   :  { %313 = vmatpush.bf16.msrb.mxu3 %v2371_v32 }
  0xb1   :  { %v143_v12 = vpop.f32.mrf.mxu0 }
  0xb2   :  { %v144_v13 = vadd.f32 %v1909_v11, %v143_v12 }
  0xb4   :  { %1920 = vtanh.f32 %v144_v13 }
  0xb9   :  { %v145_v14 = vpop.f32.mrf.mxu0 }
  0xba   :  { %v1921_v15 = vpop.eup %1920 }
  0xbb   :  { %v154_v16 = vpack.c.bf16 %v1921_v15, %v1921_v15 }
  0xbd   :  { %1803 = vmatmul.msk.bf16.vlgmr.msra.gmra.mxu1 %vm159_vm2, %v154_v16 }
  0xbe   :  { %377 = vmatpush.bf16.msra.mxu1 %v2348_v23 }
 0x13a   :  { %v172_v18 = vpop.f32.mrf.mxu1 }
 0x13b   :  { %v173_v19 = vadd.f32 %v1910_v17, %v172_v18 }
 0x13d   :  { %177 = vrot.lane.b32.xlu0 %v173_v19, %s2173_s0 }
 0x142   :  { %v174_v20 = vpop.f32.mrf.mxu1 }
 0x1af   :  { %v178_v24 = vpop.permute.xlu0 %177 }
 0x1b0   :  { %v2356_v25 = vsel %vm126_vm1, %v118_v1, %v178_v24 }
 0x1b1   :  { %v200_v26 = vpack.c.bf16 %v2356_v25, %v2356_v25  ;;  %182 = vst.msk [vmem:[#allocation2] sm:$0xf] %vm181_vm3, %v2356_v25 }
 0x1b3   :  { %1804 = vmatmul.msk.bf16.vlgmr.msra.gmra.mxu2 %vm201_vm4, %v200_v26 }
 0x1b4   :  { %352 = vmatpush.bf16.msra.mxu2 %v2365_v29 }
 0x1b8   :  { %353 = vmatpush.bf16.msra.mxu2 %v2371_v32 }
 0x236   :  { %v214_v34 = vpop.f32.mrf.mxu2 }
 0x237   :  { %v215_v35 = vadd.f32 %v2380_v33, %v214_v34 }
 0x239   :  { %1922 = vtanh.f32 %v215_v35 }
 0x23e   :  { %v216_v36 = vpop.f32.mrf.mxu2 }
 0x23f   :  { %v1923_v37 = vpop.eup %1922 }
 0x240   :  { %v219_v38 = vmul.f32 %v1923_v37, %v1923_v37 }
 0x242   :  { %v220_v40 = vsub.f32 1.0, %v219_v38 }
 0x244   :  { %v221_v41 = vmul.f32 %v2384_v39, %v220_v40 }
 0x246   :  { %v222_v42 = vpack.c.bf16 %v221_v41, %v221_v41 }
 0x248   :  { %1805 = vmatmul.msk.bf16.vlgmr.msra.gmra.mxu3 %vm159_vm2, %v222_v42 }
 0x249   :  { %397 = vmatpush.bf16.msra.mxu3 %v2365_v29 }
 0x24d   :  { %398 = vmatpush.bf16.msra.mxu3 %v2371_v32 }
 0x2cb   :  { %v235_v43 = vpop.f32.mrf.mxu3 }
 0x2cc   :  { %v239_v44 = vmul.f32 0.125, %v235_v43 }
 0x2ce   :  { %v240_v45 = vadd.f32 %v239_v44, %v2356_v25 }
 0x2d0   :  { %v241_v46 = vpack.c.bf16 %v240_v45, %v240_v45 }
 0x2d2   :  { %1806 = vmatmul.msk.bf16.vlgmr.msrb.gmra.mxu0 %vm201_vm4, %v241_v46 }
 0x2d3   :  { %v237_v47 = vpop.f32.mrf.mxu3  ;;  %417 = vmatpush.bf16.msrb.mxu0 %v2348_v23 }
 0x34f   :  { %v254_v48 = vpop.f32.mrf.mxu0 }
 0x350   :  { %v255_v49 = vadd.f32 %v2380_v33, %v254_v48 }
 0x352   :  { %1924 = vtanh.f32 %v255_v49 }
 0x357   :  { %v256_v50 = vpop.f32.mrf.mxu0 }
 0x358   :  { %v1925_v51 = vpop.eup %1924 }
 0x359   :  { %v259_v52 = vmul.f32 %v1925_v51, %v1925_v51 }
 0x35b   :  { %v260_v53 = vsub.f32 1.0, %v259_v52 }
 0x35d   :  { %v261_v54 = vmul.f32 %v2384_v39, %v260_v53 }
 0x35f   :  { %v262_v55 = vpack.c.bf16 %v261_v54, %v261_v54 }
 0x361   :  { %1807 = vmatmul.msk.bf16.vlgmr.msrb.gmra.mxu2 %vm159_vm2, %v262_v55 }
 0x362   :  { %437 = vmatpush.bf16.msrb.mxu2 %v2365_v29 }
 0x366   :  { %438 = vmatpush.bf16.msrb.mxu2 %v2371_v32 }
 0x3e4   :  { %v275_v56 = vpop.f32.mrf.mxu2 }
 0x3e5   :  { %v279_v57 = vmul.f32 0.125, %v275_v56  ;;  %v359_v5 = vmul.f32 2.0, %v275_v56 }
 0x3e7   :  { %v280_v58 = vadd.f32 %v279_v57, %v2356_v25  ;;  %v360_v7 = vadd.f32 %v359_v5, %v235_v43 }
 0x3e9   :  { %v281_v59 = vpack.c.bf16 %v280_v58, %v280_v58 }
 0x3eb   :  { %1808 = vmatmul.msk.bf16.vlgmr.msrb.gmra.mxu1 %vm201_vm4, %v281_v59 }
 0x3ec   :  { %v277_v60 = vpop.f32.mrf.mxu2  ;;  %457 = vmatpush.bf16.msrb.mxu1 %v2348_v23 }
 0x468   :  { %v294_v61 = vpop.f32.mrf.mxu1 }
 0x469   :  { %v295_v62 = vadd.f32 %v2380_v33, %v294_v61 }
 0x46b   :  { %1926 = vtanh.f32 %v295_v62 }
 0x470   :  { %v296_v63 = vpop.f32.mrf.mxu1 }
 0x471   :  { %v1927_v0 = vpop.eup %1926 }
 0x472   :  { %v299_v1 = vmul.f32 %v1927_v0, %v1927_v0 }
 0x474   :  { %v300_v2 = vsub.f32 1.0, %v299_v1 }
 0x476   :  { %v301_v3 = vmul.f32 %v2384_v39, %v300_v2 }
 0x478   :  { %v302_v4 = vpack.c.bf16 %v301_v3, %v301_v3 }
 0x47a   :  { %1809 = vmatmul.msk.bf16.vlgmr.msrb.gmra.mxu3 %vm159_vm2, %v302_v4 }
 0x47b   :  { %477 = vmatpush.bf16.msrb.mxu3 %v2365_v29 }
 0x47f   :  { %478 = vmatpush.bf16.msrb.mxu3 %v2371_v32 }
 0x4fd   :  { %v315_v6 = vpop.f32.mrf.mxu3 }
 0x4fe   :  { %v319_v8 = vmul.f32 0.25, %v315_v6  ;;  %v361_v9 = vmul.f32 2.0, %v315_v6 }
 0x500   :  { %v320_v10 = vadd.f32 %v319_v8, %v2356_v25  ;;  %v362_v11 = vadd.f32 %v361_v9, %v360_v7 }
 0x502   :  { %v321_v12 = vpack.c.bf16 %v320_v10, %v320_v10 }
 0x504   :  { %1810 = vmatmul.msk.bf16.vlgmr.msra.gmra.mxu0 %vm201_vm4, %v321_v12 }
 0x505   :  { %v317_v13 = vpop.f32.mrf.mxu3  ;;  %497 = vmatpush.bf16.msra.mxu0 %v2348_v23 }
 0x581   :  { %v334_v14 = vpop.f32.mrf.mxu0 }
 0x582   :  { %v335_v15 = vadd.f32 %v2380_v33, %v334_v14 }
 0x584   :  { %1928 = vtanh.f32 %v335_v15 }
 0x589   :  { %v336_v16 = vpop.f32.mrf.mxu0 }
 0x58a   :  { %v1929_v17 = vpop.eup %1928 }
 0x58b   :  { %v339_v18 = vmul.f32 %v1929_v17, %v1929_v17 }
 0x58d   :  { %v340_v19 = vsub.f32 1.0, %v339_v18 }
 0x58f   :  { %v341_v20 = vmul.f32 %v2384_v39, %v340_v19 }
 0x591   :  { %v342_v21 = vpack.c.bf16 %v341_v20, %v341_v20 }
 0x593   :  { %1811 = vmatmul.msk.bf16.vlgmr.msra.gmra.mxu2 %vm159_vm2, %v342_v21 }
 0x594   :  { %517 = vmatpush.bf16.msra.mxu2 %v2365_v29 }
 0x598   :  { %518 = vmatpush.bf16.msra.mxu2 %v2371_v32 }
 0x616   :  { %v355_v22 = vpop.f32.mrf.mxu2 }
 0x617   :  { %v363_v24 = vadd.f32 %v362_v11, %v355_v22 }
 0x619   :  { %v364_v26 = vmul.f32 0.041666668, %v363_v24 }
 0x61b   :  { %v2415_v27 = vadd.f32 %v364_v26, %v2356_v25 }
 0x61d   :  { %v366_v28 = vpack.c.bf16 %v2415_v27, %v2415_v27 }
 0x61e   :  { %v357_v30 = vpop.f32.mrf.mxu2 }
 0x61f   :  { %1812 = vmatmul.msk.bf16.vlgmr.msra.gmra.mxu1 %vm201_vm4, %v366_v28 }
 0x620   :  { %542 = vmatpush.bf16.msra.mxu1 %v2348_v23 }
 0x69c   :  { %v379_v31 = vpop.f32.mrf.mxu1 }
 0x69d   :  { %v380_v34 = vadd.f32 %v2380_v33, %v379_v31 }
 0x69f   :  { %1930 = vtanh.f32 %v380_v34 }
 0x6a4   :  { %v381_v35 = vpop.f32.mrf.mxu1 }
 0x6a5   :  { %v1931_v36 = vpop.eup %1930 }
 0x6a6   :  { %v384_v37 = vmul.f32 %v1931_v36, %v1931_v36 }
 0x6a8   :  { %v385_v38 = vsub.f32 1.0, %v384_v37 }
 0x6aa   :  { %v386_v40 = vmul.f32 %v2384_v39, %v385_v38 }
 0x6ac   :  { %v387_v25 = vpack.c.bf16 %v386_v40, %v386_v40 }
 0x6ae   :  { %1813 = vmatmul.msk.bf16.vlgmr.msra.gmra.mxu3 %vm159_vm2, %v387_v25 }
 0x6af   :  { %562 = vmatpush.bf16.msra.mxu3 %v2365_v29 }
 0x6b3   :  { %563 = vmatpush.bf16.msra.mxu3 %v2371_v32 }
 0x731   :  { %v400_v41 = vpop.f32.mrf.mxu3 }
 0x732   :  { %v404_v42 = vmul.f32 0.125, %v400_v41 }
 0x734   :  { %v405_v43 = vadd.f32 %v404_v42, %v2415_v27 }
 0x736   :  { %v406_v44 = vpack.c.bf16 %v405_v43, %v405_v43 }
 0x738   :  { %1814 = vmatmul.msk.bf16.vlgmr.msrb.gmra.mxu0 %vm201_vm4, %v406_v44 }
 0x739   :  { %v402_v45 = vpop.f32.mrf.mxu3  ;;  %582 = vmatpush.bf16.msrb.mxu0 %v2348_v23 }
 0x7b5   :  { %v419_v46 = vpop.f32.mrf.mxu0 }
 0x7b6   :  { %v420_v47 = vadd.f32 %v2380_v33, %v419_v46 }
 0x7b8   :  { %1932 = vtanh.f32 %v420_v47 }
 0x7bd   :  { %v421_v48 = vpop.f32.mrf.mxu0 }
 0x7be   :  { %v1933_v49 = vpop.eup %1932 }
 0x7bf   :  { %v424_v50 = vmul.f32 %v1933_v49, %v1933_v49 }
 0x7c1   :  { %v425_v51 = vsub.f32 1.0, %v424_v50 }
 0x7c3   :  { %v426_v52 = vmul.f32 %v2384_v39, %v425_v51 }
 0x7c5   :  { %v427_v53 = vpack.c.bf16 %v426_v52, %v426_v52 }
 0x7c7   :  { %1815 = vmatmul.msk.bf16.vlgmr.msrb.gmra.mxu2 %vm159_vm2, %v427_v53 }
 0x7c8   :  { %602 = vmatpush.bf16.msrb.mxu2 %v2365_v29 }
 0x7cc   :  { %603 = vmatpush.bf16.msrb.mxu2 %v2371_v32 }
 0x84a   :  { %v440_v54 = vpop.f32.mrf.mxu2 }
 0x84b   :  { %v444_v55 = vmul.f32 0.125, %v440_v54  ;;  %v524_v3 = vmul.f32 2.0, %v440_v54 }
 0x84d   :  { %v445_v56 = vadd.f32 %v444_v55, %v2415_v27  ;;  %v525_v5 = vadd.f32 %v524_v3, %v400_v41 }
 0x84f   :  { %v446_v57 = vpack.c.bf16 %v445_v56, %v445_v56 }
 0x851   :  { %1816 = vmatmul.msk.bf16.vlgmr.msrb.gmra.mxu1 %vm201_vm4, %v446_v57 }
 0x852   :  { %v442_v58 = vpop.f32.mrf.mxu2  ;;  %622 = vmatpush.bf16.msrb.mxu1 %v2348_v23 }
 0x8ce   :  { %v459_v59 = vpop.f32.mrf.mxu1 }
 0x8cf   :  { %v460_v60 = vadd.f32 %v2380_v33, %v459_v59 }
 0x8d1   :  { %1934 = vtanh.f32 %v460_v60 }
 0x8d6   :  { %v461_v61 = vpop.f32.mrf.mxu1 }
 0x8d7   :  { %v1935_v62 = vpop.eup %1934 }
 0x8d8   :  { %v464_v63 = vmul.f32 %v1935_v62, %v1935_v62 }
 0x8da   :  { %v465_v0 = vsub.f32 1.0, %v464_v63 }
 0x8dc   :  { %v466_v1 = vmul.f32 %v2384_v39, %v465_v0 }
 0x8de   :  { %v467_v2 = vpack.c.bf16 %v466_v1, %v466_v1 }
 0x8e0   :  { %1817 = vmatmul.msk.bf16.vlgmr.msrb.gmra.mxu3 %vm159_vm2, %v467_v2 }
 0x8e1   :  { %642 = vmatpush.bf16.msrb.mxu3 %v2365_v29 }
 0x8e5   :  { %643 = vmatpush.bf16.msrb.mxu3 %v2371_v32 }
 0x963   :  { %v480_v4 = vpop.f32.mrf.mxu3 }
 0x964   :  { %v484_v6 = vmul.f32 0.25, %v480_v4  ;;  %v526_v7 = vmul.f32 2.0, %v480_v4 }
 0x966   :  { %v485_v8 = vadd.f32 %v484_v6, %v2415_v27  ;;  %v527_v9 = vadd.f32 %v526_v7, %v525_v5 }
 0x968   :  { %v486_v10 = vpack.c.bf16 %v485_v8, %v485_v8 }
 0x96a   :  { %1818 = vmatmul.msk.bf16.vlgmr.msra.gmra.mxu0 %vm201_vm4, %v486_v10 }
 0x96b   :  { %v482_v11 = vpop.f32.mrf.mxu3  ;;  %662 = vmatpush.bf16.msra.mxu0 %v2348_v23 }
 0x9e7   :  { %v499_v12 = vpop.f32.mrf.mxu0 }
 0x9e8   :  { %v500_v13 = vadd.f32 %v2380_v33, %v499_v12 }
 0x9ea   :  { %1936 = vtanh.f32 %v500_v13 }
 0x9ef   :  { %v501_v14 = vpop.f32.mrf.mxu0 }
 0x9f0   :  { %v1937_v15 = vpop.eup %1936 }
 0x9f1   :  { %v504_v16 = vmul.f32 %v1937_v15, %v1937_v15 }
 0x9f3   :  { %v505_v17 = vsub.f32 1.0, %v504_v16 }
 0x9f5   :  { %v506_v18 = vmul.f32 %v2384_v39, %v505_v17 }
 0x9f7   :  { %v507_v19 = vpack.c.bf16 %v506_v18, %v506_v18 }
 0x9f9   :  { %1819 = vmatmul.msk.bf16.vlgmr.msra.gmra.mxu2 %vm159_vm2, %v507_v19 }
 0x9fa   :  { %682 = vmatpush.bf16.msra.mxu2 %v2365_v29 }
 0x9fe   :  { %683 = vmatpush.bf16.msra.mxu2 %v2371_v32 }
 0xa7c   :  { %v520_v20 = vpop.f32.mrf.mxu2 }
 0xa7d   :  { %v528_v21 = vadd.f32 %v527_v9, %v520_v20 }
 0xa7f   :  { %v529_v22 = vmul.f32 0.041666668, %v528_v21 }
 0xa81   :  { %v2451_v24 = vadd.f32 %v529_v22, %v2415_v27 }
 0xa83   :  { %v531_v26 = vpack.c.bf16 %v2451_v24, %v2451_v24 }
 0xa84   :  { %v522_v28 = vpop.f32.mrf.mxu2 }
 0xa85   :  { %1820 = vmatmul.msk.bf16.vlgmr.msra.gmra.mxu1 %vm201_vm4, %v531_v26 }
 0xa86   :  { %707 = vmatpush.bf16.msra.mxu1 %v2348_v23 }
 0xb02   :  { %v544_v30 = vpop.f32.mrf.mxu1 }
 0xb03   :  { %v545_v31 = vadd.f32 %v2380_v33, %v544_v30 }
 0xb05   :  { %1938 = vtanh.f32 %v545_v31 }
 0xb0a   :  { %v546_v34 = vpop.f32.mrf.mxu1 }
 0xb0b   :  { %v1939_v35 = vpop.eup %1938 }
 0xb0c   :  { %v549_v36 = vmul.f32 %v1939_v35, %v1939_v35 }
 0xb0e   :  { %v550_v37 = vsub.f32 1.0, %v549_v36 }
 0xb10   :  { %v551_v38 = vmul.f32 %v2384_v39, %v550_v37 }
 0xb12   :  { %v552_v27 = vpack.c.bf16 %v551_v38, %v551_v38 }
 0xb14   :  { %1821 = vmatmul.msk.bf16.vlgmr.msra.gmra.mxu3 %vm159_vm2, %v552_v27 }
 0xb15   :  { %727 = vmatpush.bf16.msra.mxu3 %v2365_v29 }
 0xb19   :  { %728 = vmatpush.bf16.msra.mxu3 %v2371_v32 }
 0xb97   :  { %v565_v40 = vpop.f32.mrf.mxu3 }
 0xb98   :  { %v569_v25 = vmul.f32 0.125, %v565_v40 }
 0xb9a   :  { %v570_v41 = vadd.f32 %v569_v25, %v2451_v24 }
 0xb9c   :  { %v571_v42 = vpack.c.bf16 %v570_v41, %v570_v41 }
 0xb9e   :  { %1822 = vmatmul.msk.bf16.vlgmr.msrb.gmra.mxu0 %vm201_vm4, %v571_v42 }
 0xb9f   :  { %v567_v43 = vpop.f32.mrf.mxu3  ;;  %747 = vmatpush.bf16.msrb.mxu0 %v2348_v23 }
 0xba0   :  { %v946_v43 = vld [vmem:[%s2288_s6] sm:$0xff]  ;;  %s2174_s6 = smov [#allocation7]  }
 0xc1b   :  { %v584_v44 = vpop.f32.mrf.mxu0 }
 0xc1c   :  { %v585_v45 = vadd.f32 %v2380_v33, %v584_v44 }
 0xc1e   :  { %1940 = vtanh.f32 %v585_v45  ;;  %v947_v45 = vpack.c.bf16 %v946_v43, %v946_v43  ;;  %v975_v43 = vld [vmem:[%s2746_s5 + $0x10] sm:$0xff] }
 0xc23   :  { %v586_v46 = vpop.f32.mrf.mxu0 }
 0xc24   :  { %v1941_v47 = vpop.eup %1940 }
 0xc25   :  { %v589_v48 = vmul.f32 %v1941_v47, %v1941_v47 }
 0xc27   :  { %v590_v49 = vsub.f32 1.0, %v589_v48  ;;  %v957_v48 = vsel %vm130_vm0, %v947_v45, 0 }
 0xc29   :  { %v591_v50 = vmul.f32 %v2384_v39, %v590_v49 }
 0xc2b   :  { %v592_v51 = vpack.c.bf16 %v591_v50, %v591_v50 }
 0xc2d   :  { %1823 = vmatmul.msk.bf16.vlgmr.msrb.gmra.mxu2 %vm159_vm2, %v592_v51 }
 0xc2e   :  { %767 = vmatpush.bf16.msrb.mxu2 %v2365_v29 }
 0xc32   :  { %768 = vmatpush.bf16.msrb.mxu2 %v2371_v32 }
 0xcb0   :  { %v605_v52 = vpop.f32.mrf.mxu2 }
 0xcb1   :  { %v609_v53 = vmul.f32 0.125, %v605_v52  ;;  %v689_v1 = vmul.f32 2.0, %v605_v52 }
 0xcb3   :  { %v610_v54 = vadd.f32 %v609_v53, %v2451_v24  ;;  %v690_v3 = vadd.f32 %v689_v1, %v565_v40 }
 0xcb5   :  { %v611_v55 = vpack.c.bf16 %v610_v54, %v610_v54 }
 0xcb7   :  { %1824 = vmatmul.msk.bf16.vlgmr.msrb.gmra.mxu1 %vm201_vm4, %v611_v55 }
 0xcb8   :  { %v607_v56 = vpop.f32.mrf.mxu2  ;;  %787 = vmatpush.bf16.msrb.mxu1 %v2348_v23 }
 0xd34   :  { %v624_v57 = vpop.f32.mrf.mxu1 }
 0xd35   :  { %v625_v58 = vadd.f32 %v2380_v33, %v624_v57 }
 0xd37   :  { %1942 = vtanh.f32 %v625_v58 }
 0xd3c   :  { %v626_v59 = vpop.f32.mrf.mxu1 }
 0xd3d   :  { %v1943_v60 = vpop.eup %1942 }
 0xd3e   :  { %v629_v61 = vmul.f32 %v1943_v60, %v1943_v60 }
 0xd40   :  { %v630_v62 = vsub.f32 1.0, %v629_v61 }
 0xd42   :  { %v631_v63 = vmul.f32 %v2384_v39, %v630_v62 }
 0xd44   :  { %v632_v0 = vpack.c.bf16 %v631_v63, %v631_v63 }
 0xd46   :  { %1825 = vmatmul.msk.bf16.vlgmr.msrb.gmra.mxu3 %vm159_vm2, %v632_v0 }
 0xd47   :  { %807 = vmatpush.bf16.msrb.mxu3 %v2365_v29 }
 0xd4b   :  { %808 = vmatpush.bf16.msrb.mxu3 %v2371_v32 }
 0xdc9   :  { %v645_v2 = vpop.f32.mrf.mxu3 }
 0xdca   :  { %v649_v4 = vmul.f32 0.25, %v645_v2  ;;  %v691_v5 = vmul.f32 2.0, %v645_v2 }
 0xdcc   :  { %v650_v6 = vadd.f32 %v649_v4, %v2451_v24  ;;  %v692_v7 = vadd.f32 %v691_v5, %v690_v3 }
 0xdce   :  { %v651_v8 = vpack.c.bf16 %v650_v6, %v650_v6 }
 0xdd0   :  { %1826 = vmatmul.msk.bf16.vlgmr.msra.gmra.mxu0 %vm201_vm4, %v651_v8  ;;  %v862_v8 = vld [vmem:[%s2258_s12] sm:$0xff] }
 0xdd1   :  { %v647_v9 = vpop.f32.mrf.mxu3  ;;  %827 = vmatpush.bf16.msra.mxu0 %v2348_v23 }
 0xdd2   :  { %v863_v9 = vld [vmem:[%s2258_s12 + $0x8] sm:$0xff]  ;;  %s1717_s12 = sshll.u32 %s2174_s6, 4  ;;  %s1718_s12 = int_to_ptr.vmem [resolvable:$true] %s1717_s12 }
 0xe4d   :  { %v664_v10 = vpop.f32.mrf.mxu0 }
 0xe4e   :  { %v665_v11 = vadd.f32 %v2380_v33, %v664_v10  ;;  %v864_v10 = vpack.c.bf16 %v863_v9, %v862_v8  ;;  %v1917_v9 = vld [vmem:[%s2752_s3] ss:$0 sm:$0xff] }
 0xe50   :  { %1944 = vtanh.f32 %v665_v11 }
 0xe55   :  { %v666_v12 = vpop.f32.mrf.mxu0 }
 0xe56   :  { %v1945_v13 = vpop.eup %1944 }
 0xe57   :  { %v669_v14 = vmul.f32 %v1945_v13, %v1945_v13 }
 0xe59   :  { %v670_v15 = vsub.f32 1.0, %v669_v14 }
 0xe5b   :  { %v671_v16 = vmul.f32 %v2384_v39, %v670_v15 }
 0xe5d   :  { %v672_v17 = vpack.c.bf16 %v671_v16, %v671_v16 }
 0xe5f   :  { %1827 = vmatmul.msk.bf16.vlgmr.msra.gmra.mxu2 %vm159_vm2, %v672_v17 }
 0xe60   :  { %847 = vmatpush.bf16.msra.mxu2 %v2365_v29 }
 0xe64   :  { %848 = vmatpush.bf16.msra.mxu2 %v2371_v32 }
 0xee2   :  { %v685_v18 = vpop.f32.mrf.mxu2 }
 0xee3   :  { %v693_v19 = vadd.f32 %v692_v7, %v685_v18 }
 0xee5   :  { %v694_v23 = vmul.f32 0.041666668, %v693_v19  ;;  %v916_v19 = vld [vmem:[%s2278_s30 + $0x10] sm:$0xff] }
 0xee7   :  { %v2487_v20 = vadd.f32 %v694_v23, %v2451_v24  ;;  %v917_v23 = vld [vmem:[%s2278_s30 + $0x18] sm:$0xff] }
 0xee9   :  { %v696_v21 = vpack.c.bf16 %v2487_v20, %v2487_v20 }
 0xeea   :  { %v687_v22 = vpop.f32.mrf.mxu2 }
 0xeeb   :  { %1828 = vmatmul.msk.bf16.vlgmr.msra.gmra.mxu1 %vm201_vm4, %v696_v21  ;;  %v919_v21 = vpack.c.bf16 %v917_v23, %v916_v19  ;;  %v2572_v23 = vld [vmem:[%s2754_s14] ss:$0 sm:$0xff] }
 0xeec   :  { %880 = vmatpush.bf16.msra.mxu1 %v864_v10 }
 0xf68   :  { %v709_v26 = vpop.f32.mrf.mxu1 }
 0xf69   :  { %v710_v28 = vadd.f32 %v2380_v33, %v709_v26 }
 0xf6b   :  { %1946 = vtanh.f32 %v710_v28 }
 0xf70   :  { %v711_v30 = vpop.f32.mrf.mxu1 }
 0xf71   :  { %v1947_v29 = vpop.eup %1946 }
 0xf72   :  { %v714_v31 = vmul.f32 %v1947_v29, %v1947_v29  ;;  %v889_v29 = vld [vmem:[%s2268_s27 + $0x10] sm:$0xff] }
 0xf74   :  { %v715_v32 = vsub.f32 1.0, %v714_v31  ;;  %v890_v31 = vld [vmem:[%s2268_s27 + $0x18] sm:$0xff] }
 0xf76   :  { %v716_v34 = vmul.f32 %v2384_v39, %v715_v32  ;;  %v892_v32 = vpack.c.bf16 %v890_v31, %v889_v29 }
 0xf78   :  { %v717_v35 = vpack.c.bf16 %v716_v34, %v716_v34  ;;  %v914_v34 = vld [vmem:[%s2278_s30] sm:$0xff] }
 0xf7a   :  { %1829 = vmatmul.msk.bf16.vlgmr.msra.gmra.mxu3 %vm159_vm2, %v717_v35  ;;  %v915_v35 = vld [vmem:[%s2278_s30 + $0x8] sm:$0xff]  ;;  %s2755_s30 = sld [smem:[#allocation19_spill]] }
 0xf7b   :  { %907 = vmatpush.bf16.msra.mxu3 %v892_v32 }
 0xffd   :  { %v730_v24 = vpop.f32.mrf.mxu3 }
 0xffe   :  { %v734_v36 = vmul.f32 0.125, %v730_v24 }
0x1000   :  { %v735_v37 = vadd.f32 %v734_v36, %v2487_v20  ;;  %v918_v36 = vpack.c.bf16 %v915_v35, %v914_v34 }
0x1002   :  { %v736_v38 = vpack.c.bf16 %v735_v37, %v735_v37  ;;  %v888_v37 = vld [vmem:[%s2268_s27 + $0x8] sm:$0xff] }
0x1004   :  { %1830 = vmatmul.msk.bf16.vlgmr.msrb.gmra.mxu0 %vm201_vm4, %v736_v38 }
0x1005   :  { %v732_v27 = vpop.f32.mrf.mxu3  ;;  %930 = vmatpush.bf16.msrb.mxu0 %v919_v21 }
0x1009   :  { %931 = vmatpush.bf16.msrb.mxu0 %v918_v36 }
0x1081   :  { %v749_v40 = vpop.f32.mrf.mxu0 }
0x1082   :  { %v750_v25 = vadd.f32 %v2380_v33, %v749_v40 }
0x1084   :  { %1948 = vtanh.f32 %v750_v25 }
0x1089   :  { %v751_v41 = vpop.f32.mrf.mxu0 }
0x108a   :  { %v1949_v42 = vpop.eup %1948 }
0x108b   :  { %v754_v44 = vmul.f32 %v1949_v42, %v1949_v42 }
0x108d   :  { %v755_v46 = vsub.f32 1.0, %v754_v44  ;;  %v976_v44 = vld [vmem:[%s2746_s5 + $0x18] sm:$0xff] }
0x108e   :  { %v978_v45 = vpack.c.bf16 %v976_v44, %v975_v43 }
0x108f   :  { %v756_v47 = vmul.f32 %v2384_v39, %v755_v46  ;;  %v1914_v46 = vld [vmem:[%s2747_s13] ss:$0 sm:$0xff] }
0x1091   :  { %v757_v49 = vpack.c.bf16 %v756_v47, %v756_v47 }
0x1093   :  { %1831 = vmatmul.msk.bf16.vlgmr.msrb.gmra.mxu2 %vm159_vm2, %v757_v49 }
0x1094   :  { %966 = vmatpush.bf16.msrb.mxu2 %v957_v48 }
0x1116   :  { %v770_v50 = vpop.f32.mrf.mxu2 }
0x1117   :  { %v774_v51 = vmul.f32 0.125, %v770_v50  ;;  %v854_v63 = vmul.f32 2.0, %v770_v50  ;;  %v1915_v50 = vld [vmem:[%s2748_s17] ss:$0 sm:$0xff] }
0x1119   :  { %v775_v52 = vadd.f32 %v774_v51, %v2487_v20  ;;  %v855_v1 = vadd.f32 %v854_v63, %v730_v24  ;;  %v887_v24 = vld [vmem:[%s2268_s27] sm:$0xff] }
0x111a   :  { %v891_v38 = vpack.c.bf16 %v888_v37, %v887_v24 }
0x111b   :  { %v776_v53 = vpack.c.bf16 %v775_v52, %v775_v52 }
0x111c   :  { %908 = vmatpush.bf16.msra.mxu3 %v891_v38 }
0x111d   :  { %1832 = vmatmul.msk.bf16.vlgmr.msrb.gmra.mxu1 %vm201_vm4, %v776_v53 }
0x111e   :  { %v772_v54 = vpop.f32.mrf.mxu2  ;;  %993 = vmatpush.bf16.msrb.mxu1 %v978_v45 }
0x119a   :  { %v789_v55 = vpop.f32.mrf.mxu1 }
0x119b   :  { %v790_v56 = vadd.f32 %v2380_v33, %v789_v55  ;;  %v940_v55 = vld [vmem:[%s2749_s21] sm:$0xf] }
0x119d   :  { %1950 = vtanh.f32 %v790_v56 }
0x11a2   :  { %v791_v57 = vpop.f32.mrf.mxu1 }
0x11a3   :  { %v1951_v58 = vpop.eup %1950 }
0x11a4   :  { %v794_v59 = vmul.f32 %v1951_v58, %v1951_v58 }
0x11a6   :  { %v795_v60 = vsub.f32 1.0, %v794_v59 }
0x11a8   :  { %v796_v61 = vmul.f32 %v2384_v39, %v795_v60 }
0x11aa   :  { %v797_v62 = vpack.c.bf16 %v796_v61, %v796_v61  ;;  %v973_v61 = vld [vmem:[%s2746_s5] sm:$0xff] }
0x11ac   :  { %1833 = vmatmul.msk.bf16.vlgmr.msrb.gmra.mxu3 %vm159_vm2, %v797_v62  ;;  %v974_v62 = vld [vmem:[%s2746_s5 + $0x8] sm:$0xff] }
0x11ad   :  { %v977_v63 = vpack.c.bf16 %v974_v62, %v973_v61 }
0x11af   :  { %994 = vmatpush.bf16.msrb.mxu1 %v977_v63 }
0x122f   :  { %v810_v0 = vpop.f32.mrf.mxu3 }
0x1230   :  { %v814_v2 = vmul.f32 0.25, %v810_v0  ;;  %v856_v3 = vmul.f32 2.0, %v810_v0  ;;  %v1001_v0 = vld [vmem:[%s2750_s25] sm:$0xff] }
0x1232   :  { %v815_v4 = vadd.f32 %v814_v2, %v2487_v20  ;;  %v857_v5 = vadd.f32 %v856_v3, %v855_v1  ;;  %v1002_v1 = vld [vmem:[%s2750_s25 + $0x8] sm:$0xff]  ;;  %v1916_v3 = vld [vmem:[%s2751_s29] ss:$0 sm:$0xff] }
0x1233   :  { %v2538_v2 = vpack.c.bf16 %v1002_v1, %v1001_v0 }
0x1234   :  { %v816_v6 = vpack.c.bf16 %v815_v4, %v815_v4 }
0x1235   :  { %1029 = vmatpush.bf16.msrb.mxu3 %v2538_v2 }
0x1236   :  { %1834 = vmatmul.msk.bf16.vlgmr.msra.gmra.mxu0 %vm201_vm4, %v816_v6 }
0x1237   :  { %v812_v7 = vpop.f32.mrf.mxu3 }
0x12b3   :  { %v829_v11 = vpop.f32.mrf.mxu0 }
0x12b4   :  { %v830_v12 = vadd.f32 %v2380_v33, %v829_v11 }
0x12b6   :  { %1952 = vtanh.f32 %v830_v12 }
0x12bb   :  { %v831_v13 = vpop.f32.mrf.mxu0 }
0x12bc   :  { %v1953_v14 = vpop.eup %1952 }
0x12bd   :  { %v834_v15 = vmul.f32 %v1953_v14, %v1953_v14  ;;  %v1006_v14 = vld [vmem:[%s2753_s8 + $0x10] sm:$0xff] }
0x12bf   :  { %v835_v16 = vsub.f32 1.0, %v834_v15  ;;  %v1007_v15 = vld [vmem:[%s2753_s8 + $0x18] sm:$0xff] }
0x12c1   :  { %v836_v17 = vmul.f32 %v2384_v39, %v835_v16  ;;  %v2557_v16 = vpack.c.bf16 %v1007_v15, %v1006_v14 }
0x12c3   :  { %v837_v18 = vpack.c.bf16 %v836_v17, %v836_v17  ;;  %1049 = vmatpush.bf16.msra.mxu0 %v2557_v16  ;;  %v1004_v17 = vld [vmem:[%s2753_s8] sm:$0xff] }
0x12c5   :  { %1835 = vmatmul.msk.bf16.vlgmr.msra.gmra.mxu2 %vm159_vm2, %v837_v18  ;;  %v1005_v18 = vld [vmem:[%s2753_s8 + $0x8] sm:$0xff] }
0x12c6   :  { %1069 = vmatpush.bf16.msra.mxu2 %v2538_v2  ;;  %v2563_v19 = vpack.c.bf16 %v1005_v18, %v1004_v17 }
0x12c8   :  { %1050 = vmatpush.bf16.msra.mxu0 %v2563_v19 }
0x1348   :  { %v850_v33 = vpop.f32.mrf.mxu2 }
0x1349   :  { %v858_v22 = vadd.f32 %v857_v5, %v850_v33 }
0x134b   :  { %v859_v26 = vmul.f32 0.041666668, %v858_v22 }
0x134d   :  { %v860_v28 = vadd.f32 %v859_v26, %v2487_v20  ;;  %v1913_v20 = vld [vmem:[%s2263_s20] ss:$0 sm:$0xff]  ;;  %s1719_s20 = sshll.u32 %s2323_s4, 4  ;;  %s1720_s20 = int_to_ptr.hbm [resolvable:$true] %s1719_s20 }
0x134e   :  { %s2004_s27 = sshra.s32 %s1720_s20, 4  ;;  %s2005_s27 = int_to_ptr.hbm [resolvable:$true] %s2004_s27 }
0x134f   :  { %v865_v30 = vpack.c.bf16 %v860_v28, %v860_v28  ;;  %861 = vst.msk [vmem:[#allocation6] sm:$0xf] %vm181_vm3, %v860_v28  ;;  %v2576_v28 = vld [vmem:[%s2755_s30] ss:$0 sm:$0xff]  ;;  %s2006_s7 = scalar_lea.hbm %s2005_s27, 4  ;;  %p2009_p1 = scmp.lt.s32.totalorder %s2005_s27, %s2323_s4 }
0x1350   :  { %v852_v39 = vpop.f32.mrf.mxu2  ;;  %p2007_p0 = scmp.ne.s32.totalorder %s2005_s27, %s2006_s7  ;;  %p2010_p2 = scmp.lt.s32.totalorder %s2008_s10, %s2006_s7 }
0x1351   :  { %1836 = vmatmul.msk.bf16.vlgmr.msra.gmra.mxu1 %vm201_vm4, %v865_v30 }
0x1352   :  { %1089 = vmatpush.bf16.msra.mxu1 %v2557_v16  ;;  %p2011_p3 = por %p2010_p2, %p2009_p1 }
0x1354   :  { %p2012_p4 = pnand %p2011_p3, %p2007_p0 }
0x1356   :  { %1090 = vmatpush.bf16.msra.mxu1 %v2563_v19 }
0x13ce   :  { %v882_v27 = vpop.f32.mrf.mxu1 }
0x13cf   :  { %v883_v40 = vadd.f32 %v1913_v20, %v882_v27 }
0x13d1   :  { %1954 = vtanh.f32 %v883_v40 }
0x13d6   :  { %v884_v25 = vpop.f32.mrf.mxu1 }
0x13d7   :  { %v1955_v41 = vpop.eup %1954 }
0x13d8   :  { %v893_v42 = vpack.c.bf16 %v1955_v41, %v1955_v41 }
0x13da   :  { %1837 = vmatmul.msk.bf16.vlgmr.msra.gmra.mxu3 %vm159_vm2, %v893_v42  ;;  %1838 = vmatmul.msk.bf16.vlgmr.msrb.gmra.mxu0 %vm159_vm2, %v893_v42 }
0x13db   :  { %1109 = vmatpush.bf16.msra.mxu3 %v2538_v2  ;;  %1129 = vmatpush.bf16.msrb.mxu0 %v2557_v16 }
0x13df   :  { %1130 = vmatpush.bf16.msrb.mxu0 %v2563_v19 }
0x1457   :  { %v933_v47 = vpop.f32.mrf.mxu0 }
0x1458   :  { %v934_v48 = vadd.f32 %v1914_v46, %v933_v47 }
0x145a   :  { %939 = vst.msk [vmem:[#allocation10] sm:$0xf] %vm937_vm5, %v934_v48  ;;  %v941_v49 = vmul.f32 0.5, %v934_v48 }
0x145c   :  { %v942_v51 = vmul.f32 1.442695, %v941_v49 }
0x145d   :  { %v910_v52 = vpop.f32.mrf.mxu3 }
0x145e   :  { %1956 = vpow2.f32 %v942_v51  ;;  %v911_v53 = vadd.f32 %v1915_v50, %v910_v52 }
0x145f   :  { %v935_v54 = vpop.f32.mrf.mxu0 }
0x1460   :  { %938 = vst.msk [vmem:[#allocation9] sm:$0xf] %vm937_vm5, %v911_v53 }
0x1464   :  { %v1957_v56 = vpop.eup %1956 }
0x1465   :  { %v944_v57 = vmul.f32 %v1957_v56, %v940_v55  ;;  %v912_v58 = vpop.f32.mrf.mxu3 }
0x1467   :  { %v945_v59 = vadd.f32 %v944_v57, %v911_v53 }
0x1469   :  { %v948_v60 = vpack.c.bf16 %v945_v59, %v945_v59 }
0x146b   :  { %1839 = vmatmul.msk.bf16.vlgmr.msrb.gmra.mxu2 %vm126_vm1, %v948_v60 }
0x146c   :  { %1149 = vmatpush.bf16.msrb.mxu2 %v2538_v2 }
0x14ee   :  { %v968_v4 = vpop.f32.mrf.mxu2 }
0x14ef   :  { %v969_v5 = vadd.f32 %v1916_v3, %v968_v4 }
0x14f1   :  { %1958 = vtanh.f32 %v969_v5 }
0x14f6   :  { %v970_v6 = vpop.f32.mrf.mxu2 }
0x14f7   :  { %v1959_v7 = vpop.eup %1958 }
0x14f8   :  { %v979_v8 = vpack.c.bf16 %v1959_v7, %v1959_v7 }
0x14fa   :  { %1840 = vmatmul.msk.bf16.vlgmr.msrb.gmra.mxu1 %vm159_vm2, %v979_v8 }
0x14fb   :  { %1169 = vmatpush.bf16.msrb.mxu1 %v2557_v16 }
0x14ff   :  { %1170 = vmatpush.bf16.msrb.mxu1 %v2563_v19 }
0x1577   :  { %v996_v10 = vpop.f32.mrf.mxu1 }
0x1578   :  { %v2547_v11 = vadd.f32 %v1917_v9, %v996_v10 }
0x157a   :  { %v1018_v12 = vpack.c.bf16 %v2547_v11, %v2547_v11  ;;  %1000 = vst.msk [vmem:[#allocation7] sm:$0xf] %vm181_vm3, %v2547_v11 }
0x157c   :  { %1841 = vmatmul.msk.bf16.vlgmr.msrb.gmra.mxu3 %vm201_vm4, %v1018_v12 }
0x157d   :  { %1194 = vmatpush.bf16.msrb.mxu3 %v2538_v2 }
0x157f   :  { %v998_v13 = vpop.f32.mrf.mxu1 }
0x15ff   :  { %v1031_v21 = vpop.f32.mrf.mxu3 }
0x1600   :  { %v1032_v33 = vadd.f32 %v2572_v23, %v1031_v21 }
0x1602   :  { %1960 = vtanh.f32 %v1032_v33 }
0x1607   :  { %v1033_v22 = vpop.f32.mrf.mxu3 }
0x1608   :  { %v1961_v26 = vpop.eup %1960 }
0x1609   :  { %v1036_v30 = vmul.f32 %v1961_v26, %v1961_v26 }
0x160b   :  { %v1037_v39 = vsub.f32 1.0, %v1036_v30 }
0x160d   :  { %v1038_v29 = vmul.f32 %v2576_v28, %v1037_v39 }
0x160f   :  { %v1039_v31 = vpack.c.bf16 %v1038_v29, %v1038_v29 }
0x1611   :  { %1842 = vmatmul.msk.bf16.vlgmr.msra.gmra.mxu0 %vm159_vm2, %v1039_v31 }
0x1612   :  { %1214 = vmatpush.bf16.msra.mxu0 %v2557_v16 }
0x1616   :  { %1215 = vmatpush.bf16.msra.mxu0 %v2563_v19 }
0x168e   :  { %v1052_v32 = vpop.f32.mrf.mxu0 }
0x168f   :  { %v1056_v34 = vmul.f32 0.125, %v1052_v32 }
0x1691   :  { %v1057_v35 = vadd.f32 %v1056_v34, %v2547_v11 }
0x1693   :  { %v1058_v24 = vpack.c.bf16 %v1057_v35, %v1057_v35 }
0x1695   :  { %1843 = vmatmul.msk.bf16.vlgmr.msra.gmra.mxu2 %vm201_vm4, %v1058_v24 }
0x1696   :  { %v1054_v36 = vpop.f32.mrf.mxu0  ;;  %1234 = vmatpush.bf16.msra.mxu2 %v2538_v2 }
0x1718   :  { %v1071_v37 = vpop.f32.mrf.mxu2 }
0x1719   :  { %v1072_v38 = vadd.f32 %v2572_v23, %v1071_v37 }
0x171b   :  { %1962 = vtanh.f32 %v1072_v38 }
0x1720   :  { %v1073_v20 = vpop.f32.mrf.mxu2 }
0x1721   :  { %v1963_v27 = vpop.eup %1962 }
0x1722   :  { %v1076_v40 = vmul.f32 %v1963_v27, %v1963_v27 }
0x1724   :  { %v1077_v25 = vsub.f32 1.0, %v1076_v40 }
0x1726   :  { %v1078_v41 = vmul.f32 %v2576_v28, %v1077_v25 }
0x1728   :  { %v1079_v42 = vpack.c.bf16 %v1078_v41, %v1078_v41 }
0x172a   :  { %1844 = vmatmul.msk.bf16.vlgmr.msra.gmra.mxu1 %vm159_vm2, %v1079_v42 }
0x172b   :  { %1254 = vmatpush.bf16.msra.mxu1 %v2557_v16 }
0x172f   :  { %1255 = vmatpush.bf16.msra.mxu1 %v2563_v19 }
0x17a7   :  { %v1092_v43 = vpop.f32.mrf.mxu1 }
0x17a8   :  { %v1096_v44 = vmul.f32 0.125, %v1092_v43  ;;  %v1176_v56 = vmul.f32 2.0, %v1092_v43 }
0x17aa   :  { %v1097_v45 = vadd.f32 %v1096_v44, %v2547_v11  ;;  %v1177_v58 = vadd.f32 %v1176_v56, %v1052_v32 }
0x17ac   :  { %v1098_v46 = vpack.c.bf16 %v1097_v45, %v1097_v45 }
0x17ae   :  { %1845 = vmatmul.msk.bf16.vlgmr.msra.gmra.mxu3 %vm201_vm4, %v1098_v46 }
0x17af   :  { %v1094_v47 = vpop.f32.mrf.mxu1  ;;  %1274 = vmatpush.bf16.msra.mxu3 %v2538_v2 }
0x1831   :  { %v1111_v48 = vpop.f32.mrf.mxu3 }
0x1832   :  { %v1112_v49 = vadd.f32 %v2572_v23, %v1111_v48 }
0x1834   :  { %1964 = vtanh.f32 %v1112_v49 }
0x1839   :  { %v1113_v50 = vpop.f32.mrf.mxu3 }
0x183a   :  { %v1965_v51 = vpop.eup %1964 }
0x183b   :  { %v1116_v52 = vmul.f32 %v1965_v51, %v1965_v51 }
0x183d   :  { %v1117_v53 = vsub.f32 1.0, %v1116_v52 }
0x183f   :  { %v1118_v54 = vmul.f32 %v2576_v28, %v1117_v53 }
0x1841   :  { %v1119_v55 = vpack.c.bf16 %v1118_v54, %v1118_v54 }
0x1843   :  { %1846 = vmatmul.msk.bf16.vlgmr.msrb.gmra.mxu0 %vm159_vm2, %v1119_v55 }
0x1844   :  { %1294 = vmatpush.bf16.msrb.mxu0 %v2557_v16 }
0x1848   :  { %1295 = vmatpush.bf16.msrb.mxu0 %v2563_v19 }
0x18c0   :  { %v1132_v57 = vpop.f32.mrf.mxu0 }
0x18c1   :  { %v1136_v59 = vmul.f32 0.25, %v1132_v57  ;;  %v1178_v60 = vmul.f32 2.0, %v1132_v57 }
0x18c3   :  { %v1137_v61 = vadd.f32 %v1136_v59, %v2547_v11  ;;  %v1179_v62 = vadd.f32 %v1178_v60, %v1177_v58 }
0x18c5   :  { %v1138_v63 = vpack.c.bf16 %v1137_v61, %v1137_v61 }
0x18c7   :  { %1847 = vmatmul.msk.bf16.vlgmr.msrb.gmra.mxu2 %vm201_vm4, %v1138_v63 }
0x18c8   :  { %v1134_v0 = vpop.f32.mrf.mxu0  ;;  %1314 = vmatpush.bf16.msrb.mxu2 %v2538_v2 }
0x194a   :  { %v1151_v1 = vpop.f32.mrf.mxu2 }
0x194b   :  { %v1152_v3 = vadd.f32 %v2572_v23, %v1151_v1 }
0x194d   :  { %1966 = vtanh.f32 %v1152_v3 }
0x1952   :  { %v1153_v4 = vpop.f32.mrf.mxu2 }
0x1953   :  { %v1967_v5 = vpop.eup %1966 }
0x1954   :  { %v1156_v6 = vmul.f32 %v1967_v5, %v1967_v5 }
0x1956   :  { %v1157_v7 = vsub.f32 1.0, %v1156_v6 }
0x1958   :  { %v1158_v8 = vmul.f32 %v2576_v28, %v1157_v7 }
0x195a   :  { %v1159_v9 = vpack.c.bf16 %v1158_v8, %v1158_v8 }
0x195c   :  { %1848 = vmatmul.msk.bf16.vlgmr.msrb.gmra.mxu1 %vm159_vm2, %v1159_v9 }
0x195d   :  { %1334 = vmatpush.bf16.msrb.mxu1 %v2557_v16 }
0x1961   :  { %1335 = vmatpush.bf16.msrb.mxu1 %v2563_v19 }
0x19d9   :  { %v1172_v10 = vpop.f32.mrf.mxu1 }
0x19da   :  { %v1180_v12 = vadd.f32 %v1179_v62, %v1172_v10 }
0x19dc   :  { %v1181_v13 = vmul.f32 0.041666668, %v1180_v12 }
0x19de   :  { %v2607_v14 = vadd.f32 %v1181_v13, %v2547_v11 }
0x19e0   :  { %v1183_v15 = vpack.c.bf16 %v2607_v14, %v2607_v14 }
0x19e1   :  { %v1174_v17 = vpop.f32.mrf.mxu1 }
0x19e2   :  { %1849 = vmatmul.msk.bf16.vlgmr.msrb.gmra.mxu3 %vm201_vm4, %v1183_v15 }
0x19e3   :  { %1359 = vmatpush.bf16.msrb.mxu3 %v2538_v2 }
0x1a65   :  { %v1196_v18 = vpop.f32.mrf.mxu3 }
0x1a66   :  { %v1197_v21 = vadd.f32 %v2572_v23, %v1196_v18 }
0x1a68   :  { %1968 = vtanh.f32 %v1197_v21 }
0x1a6d   :  { %v1198_v33 = vpop.f32.mrf.mxu3 }
0x1a6e   :  { %v1969_v22 = vpop.eup %1968 }
0x1a6f   :  { %v1201_v26 = vmul.f32 %v1969_v22, %v1969_v22 }
0x1a71   :  { %v1202_v30 = vsub.f32 1.0, %v1201_v26 }
0x1a73   :  { %v1203_v39 = vmul.f32 %v2576_v28, %v1202_v30 }
0x1a75   :  { %v1204_v11 = vpack.c.bf16 %v1203_v39, %v1203_v39 }
0x1a77   :  { %1850 = vmatmul.msk.bf16.vlgmr.msra.gmra.mxu0 %vm159_vm2, %v1204_v11 }
0x1a78   :  { %1379 = vmatpush.bf16.msra.mxu0 %v2557_v16 }
0x1a7c   :  { %1380 = vmatpush.bf16.msra.mxu0 %v2563_v19 }
0x1af4   :  { %v1217_v29 = vpop.f32.mrf.mxu0 }
0x1af5   :  { %v1221_v31 = vmul.f32 0.125, %v1217_v29 }
0x1af7   :  { %v1222_v32 = vadd.f32 %v1221_v31, %v2607_v14 }
0x1af9   :  { %v1223_v34 = vpack.c.bf16 %v1222_v32, %v1222_v32 }
0x1afb   :  { %1851 = vmatmul.msk.bf16.vlgmr.msra.gmra.mxu2 %vm201_vm4, %v1223_v34 }
0x1afc   :  { %v1219_v35 = vpop.f32.mrf.mxu0  ;;  %1399 = vmatpush.bf16.msra.mxu2 %v2538_v2 }
0x1b7e   :  { %v1236_v24 = vpop.f32.mrf.mxu2 }
0x1b7f   :  { %v1237_v36 = vadd.f32 %v2572_v23, %v1236_v24 }
0x1b81   :  { %1970 = vtanh.f32 %v1237_v36 }
0x1b86   :  { %v1238_v37 = vpop.f32.mrf.mxu2 }
0x1b87   :  { %v1971_v38 = vpop.eup %1970 }
0x1b88   :  { %v1241_v20 = vmul.f32 %v1971_v38, %v1971_v38 }
0x1b8a   :  { %v1242_v27 = vsub.f32 1.0, %v1241_v20 }
0x1b8c   :  { %v1243_v40 = vmul.f32 %v2576_v28, %v1242_v27 }
0x1b8e   :  { %v1244_v25 = vpack.c.bf16 %v1243_v40, %v1243_v40 }
0x1b90   :  { %1852 = vmatmul.msk.bf16.vlgmr.msra.gmra.mxu1 %vm159_vm2, %v1244_v25 }
0x1b91   :  { %1419 = vmatpush.bf16.msra.mxu1 %v2557_v16 }
0x1b95   :  { %1420 = vmatpush.bf16.msra.mxu1 %v2563_v19 }
0x1c0d   :  { %v1257_v41 = vpop.f32.mrf.mxu1 }
0x1c0e   :  { %v1261_v42 = vmul.f32 0.125, %v1257_v41  ;;  %v1341_v54 = vmul.f32 2.0, %v1257_v41 }
0x1c10   :  { %v1262_v43 = vadd.f32 %v1261_v42, %v2607_v14  ;;  %v1342_v56 = vadd.f32 %v1341_v54, %v1217_v29 }
0x1c12   :  { %v1263_v44 = vpack.c.bf16 %v1262_v43, %v1262_v43 }
0x1c14   :  { %1853 = vmatmul.msk.bf16.vlgmr.msra.gmra.mxu3 %vm201_vm4, %v1263_v44 }
0x1c15   :  { %v1259_v45 = vpop.f32.mrf.mxu1  ;;  %1439 = vmatpush.bf16.msra.mxu3 %v2538_v2 }
0x1c97   :  { %v1276_v46 = vpop.f32.mrf.mxu3 }
0x1c98   :  { %v1277_v47 = vadd.f32 %v2572_v23, %v1276_v46 }
0x1c9a   :  { %1972 = vtanh.f32 %v1277_v47 }
0x1c9f   :  { %v1278_v48 = vpop.f32.mrf.mxu3 }
0x1ca0   :  { %v1973_v49 = vpop.eup %1972 }
0x1ca1   :  { %v1281_v50 = vmul.f32 %v1973_v49, %v1973_v49 }
0x1ca3   :  { %v1282_v51 = vsub.f32 1.0, %v1281_v50 }
0x1ca5   :  { %v1283_v52 = vmul.f32 %v2576_v28, %v1282_v51 }
0x1ca7   :  { %v1284_v53 = vpack.c.bf16 %v1283_v52, %v1283_v52 }
0x1ca9   :  { %1854 = vmatmul.msk.bf16.vlgmr.msrb.gmra.mxu0 %vm159_vm2, %v1284_v53 }
0x1caa   :  { %1459 = vmatpush.bf16.msrb.mxu0 %v2557_v16 }
0x1cae   :  { %1460 = vmatpush.bf16.msrb.mxu0 %v2563_v19 }
0x1d26   :  { %v1297_v55 = vpop.f32.mrf.mxu0 }
0x1d27   :  { %v1301_v57 = vmul.f32 0.25, %v1297_v55  ;;  %v1343_v58 = vmul.f32 2.0, %v1297_v55 }
0x1d29   :  { %v1302_v59 = vadd.f32 %v1301_v57, %v2607_v14  ;;  %v1344_v60 = vadd.f32 %v1343_v58, %v1342_v56 }
0x1d2b   :  { %v1303_v61 = vpack.c.bf16 %v1302_v59, %v1302_v59 }
0x1d2d   :  { %1855 = vmatmul.msk.bf16.vlgmr.msrb.gmra.mxu2 %vm201_vm4, %v1303_v61 }
0x1d2e   :  { %v1299_v62 = vpop.f32.mrf.mxu0  ;;  %1479 = vmatpush.bf16.msrb.mxu2 %v2538_v2 }
0x1db0   :  { %v1316_v63 = vpop.f32.mrf.mxu2 }
0x1db1   :  { %v1317_v0 = vadd.f32 %v2572_v23, %v1316_v63 }
0x1db3   :  { %1974 = vtanh.f32 %v1317_v0 }
0x1db8   :  { %v1318_v1 = vpop.f32.mrf.mxu2 }
0x1db9   :  { %v1975_v3 = vpop.eup %1974 }
0x1dba   :  { %v1321_v4 = vmul.f32 %v1975_v3, %v1975_v3 }
0x1dbc   :  { %v1322_v5 = vsub.f32 1.0, %v1321_v4 }
0x1dbe   :  { %v1323_v6 = vmul.f32 %v2576_v28, %v1322_v5 }
0x1dc0   :  { %v1324_v7 = vpack.c.bf16 %v1323_v6, %v1323_v6 }
0x1dc2   :  { %1856 = vmatmul.msk.bf16.vlgmr.msrb.gmra.mxu1 %vm159_vm2, %v1324_v7 }
0x1dc3   :  { %1499 = vmatpush.bf16.msrb.mxu1 %v2557_v16 }
0x1dc7   :  { %1500 = vmatpush.bf16.msrb.mxu1 %v2563_v19 }
0x1e3f   :  { %v1337_v8 = vpop.f32.mrf.mxu1 }
0x1e40   :  { %v1345_v9 = vadd.f32 %v1344_v60, %v1337_v8 }
0x1e42   :  { %v1346_v10 = vmul.f32 0.041666668, %v1345_v9 }
0x1e44   :  { %v2643_v12 = vadd.f32 %v1346_v10, %v2607_v14 }
0x1e46   :  { %v1348_v13 = vpack.c.bf16 %v2643_v12, %v2643_v12 }
0x1e47   :  { %v1339_v15 = vpop.f32.mrf.mxu1 }
0x1e48   :  { %1857 = vmatmul.msk.bf16.vlgmr.msrb.gmra.mxu3 %vm201_vm4, %v1348_v13 }
0x1e49   :  { %1524 = vmatpush.bf16.msrb.mxu3 %v2538_v2 }
0x1ecb   :  { %v1361_v17 = vpop.f32.mrf.mxu3 }
0x1ecc   :  { %v1362_v18 = vadd.f32 %v2572_v23, %v1361_v17 }
0x1ece   :  { %1976 = vtanh.f32 %v1362_v18 }
0x1ed3   :  { %v1363_v21 = vpop.f32.mrf.mxu3 }
0x1ed4   :  { %v1977_v33 = vpop.eup %1976 }
0x1ed5   :  { %v1366_v22 = vmul.f32 %v1977_v33, %v1977_v33 }
0x1ed7   :  { %v1367_v26 = vsub.f32 1.0, %v1366_v22 }
0x1ed9   :  { %v1368_v30 = vmul.f32 %v2576_v28, %v1367_v26 }
0x1edb   :  { %v1369_v14 = vpack.c.bf16 %v1368_v30, %v1368_v30 }
0x1edd   :  { %1858 = vmatmul.msk.bf16.vlgmr.msra.gmra.mxu0 %vm159_vm2, %v1369_v14 }
0x1ede   :  { %1544 = vmatpush.bf16.msra.mxu0 %v2557_v16 }
0x1ee2   :  { %1545 = vmatpush.bf16.msra.mxu0 %v2563_v19 }
0x1f5a   :  { %v1382_v39 = vpop.f32.mrf.mxu0 }
0x1f5b   :  { %v1386_v11 = vmul.f32 0.125, %v1382_v39 }
0x1f5d   :  { %v1387_v29 = vadd.f32 %v1386_v11, %v2643_v12 }
0x1f5f   :  { %v1388_v31 = vpack.c.bf16 %v1387_v29, %v1387_v29 }
0x1f61   :  { %1859 = vmatmul.msk.bf16.vlgmr.msra.gmra.mxu2 %vm201_vm4, %v1388_v31 }
0x1f62   :  { %v1384_v32 = vpop.f32.mrf.mxu0  ;;  %1564 = vmatpush.bf16.msra.mxu2 %v2538_v2 }
0x1fe4   :  { %v1401_v34 = vpop.f32.mrf.mxu2 }
0x1fe5   :  { %v1402_v35 = vadd.f32 %v2572_v23, %v1401_v34 }
0x1fe7   :  { %1978 = vtanh.f32 %v1402_v35 }
0x1fec   :  { %v1403_v24 = vpop.f32.mrf.mxu2 }
0x1fed   :  { %v1979_v36 = vpop.eup %1978 }
0x1fee   :  { %v1406_v37 = vmul.f32 %v1979_v36, %v1979_v36 }
0x1ff0   :  { %v1407_v38 = vsub.f32 1.0, %v1406_v37 }
0x1ff2   :  { %v1408_v20 = vmul.f32 %v2576_v28, %v1407_v38 }
0x1ff4   :  { %v1409_v27 = vpack.c.bf16 %v1408_v20, %v1408_v20 }
0x1ff6   :  { %1860 = vmatmul.msk.bf16.vlgmr.msra.gmra.mxu1 %vm159_vm2, %v1409_v27 }
0x1ff7   :  { %1584 = vmatpush.bf16.msra.mxu1 %v2557_v16 }
0x1ffb   :  { %1585 = vmatpush.bf16.msra.mxu1 %v2563_v19 }
0x2073   :  { %v1422_v40 = vpop.f32.mrf.mxu1 }
0x2074   :  { %v1426_v25 = vmul.f32 0.125, %v1422_v40  ;;  %v1506_v52 = vmul.f32 2.0, %v1422_v40 }
0x2076   :  { %v1427_v41 = vadd.f32 %v1426_v25, %v2643_v12  ;;  %v1507_v54 = vadd.f32 %v1506_v52, %v1382_v39 }
0x2078   :  { %v1428_v42 = vpack.c.bf16 %v1427_v41, %v1427_v41 }
0x207a   :  { %1861 = vmatmul.msk.bf16.vlgmr.msra.gmra.mxu3 %vm201_vm4, %v1428_v42 }
0x207b   :  { %v1424_v43 = vpop.f32.mrf.mxu1  ;;  %1604 = vmatpush.bf16.msra.mxu3 %v2538_v2 }
0x20fd   :  { %v1441_v44 = vpop.f32.mrf.mxu3 }
0x20fe   :  { %v1442_v45 = vadd.f32 %v2572_v23, %v1441_v44 }
0x2100   :  { %1980 = vtanh.f32 %v1442_v45 }
0x2105   :  { %v1443_v46 = vpop.f32.mrf.mxu3 }
0x2106   :  { %v1981_v47 = vpop.eup %1980 }
0x2107   :  { %v1446_v48 = vmul.f32 %v1981_v47, %v1981_v47 }
0x2109   :  { %v1447_v49 = vsub.f32 1.0, %v1446_v48 }
0x210b   :  { %v1448_v50 = vmul.f32 %v2576_v28, %v1447_v49 }
0x210d   :  { %v1449_v51 = vpack.c.bf16 %v1448_v50, %v1448_v50 }
0x210f   :  { %1862 = vmatmul.msk.bf16.vlgmr.msrb.gmra.mxu0 %vm159_vm2, %v1449_v51 }
0x2110   :  { %1624 = vmatpush.bf16.msrb.mxu0 %v2557_v16 }
0x2114   :  { %1625 = vmatpush.bf16.msrb.mxu0 %v2563_v19 }
0x218c   :  { %v1462_v53 = vpop.f32.mrf.mxu0 }
0x218d   :  { %v1466_v55 = vmul.f32 0.25, %v1462_v53  ;;  %v1508_v56 = vmul.f32 2.0, %v1462_v53 }
0x218f   :  { %v1467_v57 = vadd.f32 %v1466_v55, %v2643_v12  ;;  %v1509_v58 = vadd.f32 %v1508_v56, %v1507_v54 }
0x2191   :  { %v1468_v59 = vpack.c.bf16 %v1467_v57, %v1467_v57 }
0x2193   :  { %1863 = vmatmul.msk.bf16.vlgmr.msrb.gmra.mxu2 %vm201_vm4, %v1468_v59 }
0x2194   :  { %v1464_v60 = vpop.f32.mrf.mxu0  ;;  %1644 = vmatpush.bf16.msrb.mxu2 %v2538_v2 }
0x2216   :  { %v1481_v61 = vpop.f32.mrf.mxu2 }
0x2217   :  { %v1482_v62 = vadd.f32 %v2572_v23, %v1481_v61 }
0x2219   :  { %1982 = vtanh.f32 %v1482_v62 }
0x221e   :  { %v1483_v63 = vpop.f32.mrf.mxu2 }
0x221f   :  { %v1983_v0 = vpop.eup %1982 }
0x2220   :  { %v1486_v1 = vmul.f32 %v1983_v0, %v1983_v0 }
0x2222   :  { %v1487_v3 = vsub.f32 1.0, %v1486_v1 }
0x2224   :  { %v1488_v4 = vmul.f32 %v2576_v28, %v1487_v3 }
0x2226   :  { %v1489_v5 = vpack.c.bf16 %v1488_v4, %v1488_v4 }
0x2228   :  { %1864 = vmatmul.msk.bf16.vlgmr.msrb.gmra.mxu1 %vm159_vm2, %v1489_v5 }
0x2229   :  { %1664 = vmatpush.bf16.msrb.mxu1 %v2557_v16 }
0x222d   :  { %1665 = vmatpush.bf16.msrb.mxu1 %v2563_v19 }
0x22a5   :  { %v1502_v6 = vpop.f32.mrf.mxu1 }
0x22a6   :  { %v1510_v7 = vadd.f32 %v1509_v58, %v1502_v6 }
0x22a8   :  { %v1511_v2 = vmul.f32 0.041666668, %v1510_v7 }
0x22aa   :  { %v2679_v8 = vadd.f32 %v1511_v2, %v2643_v12 }
0x22ac   :  { %v1513_v9 = vpack.c.bf16 %v2679_v8, %v2679_v8 }
0x22ad   :  { %v1504_v10 = vpop.f32.mrf.mxu1 }
0x22ae   :  { %1865 = vmatmul.msk.bf16.vlgmr.msrb.gmra.mxu3 %vm201_vm4, %v1513_v9 }
0x2331   :  { %v1526_v13 = vpop.f32.mrf.mxu3 }
0x2332   :  { %v1527_v15 = vadd.f32 %v2572_v23, %v1526_v13 }
0x2334   :  { %1984 = vtanh.f32 %v1527_v15 }
0x2339   :  { %v1528_v17 = vpop.f32.mrf.mxu3 }
0x233a   :  { %v1985_v16 = vpop.eup %1984 }
0x233b   :  { %v1531_v18 = vmul.f32 %v1985_v16, %v1985_v16 }
0x233d   :  { %v1532_v19 = vsub.f32 1.0, %v1531_v18 }
0x233f   :  { %v1533_v21 = vmul.f32 %v2576_v28, %v1532_v19 }
0x2341   :  { %v1534_v33 = vpack.c.bf16 %v1533_v21, %v1533_v21 }
0x2343   :  { %1866 = vmatmul.msk.bf16.vlgmr.msra.gmra.mxu0 %vm159_vm2, %v1534_v33 }
0x23c0   :  { %v1547_v12 = vpop.f32.mrf.mxu0 }
0x23c1   :  { %v1551_v22 = vmul.f32 0.125, %v1547_v12 }
0x23c3   :  { %v1552_v26 = vadd.f32 %v1551_v22, %v2679_v8 }
0x23c5   :  { %v1553_v30 = vpack.c.bf16 %v1552_v26, %v1552_v26 }
0x23c7   :  { %1867 = vmatmul.msk.bf16.vlgmr.msra.gmra.mxu2 %vm201_vm4, %v1553_v30 }
0x23c8   :  { %v1549_v14 = vpop.f32.mrf.mxu0 }
0x244a   :  { %v1566_v39 = vpop.f32.mrf.mxu2 }
0x244b   :  { %v1567_v11 = vadd.f32 %v2572_v23, %v1566_v39 }
0x244d   :  { %1986 = vtanh.f32 %v1567_v11 }
0x2452   :  { %v1568_v29 = vpop.f32.mrf.mxu2 }
0x2453   :  { %v1987_v31 = vpop.eup %1986 }
0x2454   :  { %v1571_v32 = vmul.f32 %v1987_v31, %v1987_v31 }
0x2456   :  { %v1572_v34 = vsub.f32 1.0, %v1571_v32 }
0x2458   :  { %v1573_v35 = vmul.f32 %v2576_v28, %v1572_v34 }
0x245a   :  { %v1574_v24 = vpack.c.bf16 %v1573_v35, %v1573_v35 }
0x245c   :  { %1868 = vmatmul.msk.bf16.vlgmr.msra.gmra.mxu1 %vm159_vm2, %v1574_v24 }
0x24d9   :  { %v1587_v36 = vpop.f32.mrf.mxu1 }
0x24da   :  { %v1591_v37 = vmul.f32 0.125, %v1587_v36  ;;  %v1671_v47 = vmul.f32 2.0, %v1587_v36 }
0x24dc   :  { %v1592_v38 = vadd.f32 %v1591_v37, %v2679_v8  ;;  %v1672_v49 = vadd.f32 %v1671_v47, %v1547_v12 }
0x24de   :  { %v1593_v20 = vpack.c.bf16 %v1592_v38, %v1592_v38 }
0x24e0   :  { %1869 = vmatmul.msk.bf16.vlgmr.msra.gmra.mxu3 %vm201_vm4, %v1593_v20 }
0x24e1   :  { %v1589_v27 = vpop.f32.mrf.mxu1 }
0x2563   :  { %v1606_v40 = vpop.f32.mrf.mxu3 }
0x2564   :  { %v1607_v25 = vadd.f32 %v2572_v23, %v1606_v40 }
0x2566   :  { %1988 = vtanh.f32 %v1607_v25 }
0x256b   :  { %v1608_v41 = vpop.f32.mrf.mxu3 }
0x256c   :  { %v1989_v42 = vpop.eup %1988 }
0x256d   :  { %v1611_v43 = vmul.f32 %v1989_v42, %v1989_v42 }
0x256f   :  { %v1612_v44 = vsub.f32 1.0, %v1611_v43 }
0x2571   :  { %v1613_v45 = vmul.f32 %v2576_v28, %v1612_v44 }
0x2573   :  { %v1614_v46 = vpack.c.bf16 %v1613_v45, %v1613_v45 }
0x2575   :  { %1870 = vmatmul.msk.bf16.vlgmr.msrb.gmra.mxu0 %vm159_vm2, %v1614_v46 }
0x25f2   :  { %v1627_v48 = vpop.f32.mrf.mxu0 }
0x25f3   :  { %v1631_v50 = vmul.f32 0.25, %v1627_v48  ;;  %v1673_v51 = vmul.f32 2.0, %v1627_v48 }
0x25f5   :  { %v1632_v52 = vadd.f32 %v1631_v50, %v2679_v8  ;;  %v2698_v53 = vadd.f32 %v1673_v51, %v1672_v49 }
0x25f7   :  { %v1633_v54 = vpack.c.bf16 %v1632_v52, %v1632_v52 }
0x25f9   :  { %1871 = vmatmul.msk.bf16.vlgmr.msrb.gmra.mxu2 %vm201_vm4, %v1633_v54 }
0x25fa   :  { %v1629_v55 = vpop.f32.mrf.mxu0 }
0x267c   :  { %v1646_v56 = vpop.f32.mrf.mxu2 }
0x267d   :  { %v1647_v57 = vadd.f32 %v2572_v23, %v1646_v56 }
0x267f   :  { %1990 = vtanh.f32 %v1647_v57 }
0x2684   :  { %v1648_v58 = vpop.f32.mrf.mxu2 }
0x2685   :  { %v1991_v59 = vpop.eup %1990 }
0x2686   :  { %v1651_v60 = vmul.f32 %v1991_v59, %v1991_v59 }
0x2688   :  { %v1652_v61 = vsub.f32 1.0, %v1651_v60 }
0x268a   :  { %v1653_v62 = vmul.f32 %v2576_v28, %v1652_v61 }
0x268c   :  { %v1654_v63 = vpack.c.bf16 %v1653_v62, %v1653_v62 }
0x268e   :  { %1872 = vmatmul.msk.bf16.vlgmr.msrb.gmra.mxu1 %vm159_vm2, %v1654_v63 }
0x268f   :  { %2015 = shalt.err (!%p2012_p4)
}
0x2690   :  { %1722 = dma.vmem_to_hbm [thread:$0]  %s1718_s12, 64, %s1720_s20, [#allocation8]  }
0x2691   :  { %s2756_s11 = sld [smem:[#allocation26_spill]]  ;;  %s2175_s16 = smov [#allocation2]  }
0x2692   :  { %s1684_s18 = sshll.u32 %s2175_s16, 4  ;;  %s1685_s18 = int_to_ptr.vmem [resolvable:$true] %s1684_s18 }
0x2697   :  { %s1686_s15 = sshll.u32 %s2756_s11, 4  ;;  %s2032_s26 = scalar_lea.hbm %s2756_s11, 4  ;;  %s1687_s15 = int_to_ptr.hbm [resolvable:$true] %s1686_s15 }
0x2698   :  { %s2028_s22 = sshra.s32 %s1687_s15, 4  ;;  %s2029_s22 = int_to_ptr.hbm [resolvable:$true] %s2028_s22 }
0x2699   :  { %s2030_s23 = scalar_lea.hbm %s2029_s22, 4  ;;  %p2033_p6 = scmp.lt.s32.totalorder %s2029_s22, %s2756_s11 }
0x269a   :  { %p2031_p5 = scmp.ne.s32.totalorder %s2029_s22, %s2030_s23  ;;  %p2034_p7 = scmp.lt.s32.totalorder %s2032_s26, %s2030_s23 }
0x269c   :  { %p2035_p8 = por %p2034_p7, %p2033_p6 }
0x269e   :  { %p2036_p9 = pnand %p2035_p8, %p2031_p5 }
0x26a0   :  { %2039 = shalt.err (!%p2036_p9)
}
0x26a1   :  { %1689 = dma.vmem_to_hbm [thread:$0]  %s1685_s18, 64, %s1687_s15, [#allocation3]  }
0x26a2   :  { %s1730_s4 = sshll.u32 %s2328_s24, 4  ;;  %s2176_s28 = smov [#allocation9]   ;;  %s1731_s4 = int_to_ptr.hbm [resolvable:$true] %s1730_s4 }
0x26a3   :  { %s1728_s1 = sshll.u32 %s2176_s28, 4  ;;  %s2052_s2 = sshra.s32 %s1731_s4, 4  ;;  %s1729_s1 = int_to_ptr.vmem [resolvable:$true] %s1728_s1  ;;  %s2053_s2 = int_to_ptr.hbm [resolvable:$true] %s2052_s2 }
0x26a4   :  { %s2054_s0 = scalar_lea.hbm %s2053_s2, 4  ;;  %s2056_s5 = scalar_lea.hbm %s2328_s24, 4 }
0x26a5   :  { %p2055_p10 = scmp.ne.s32.totalorder %s2053_s2, %s2054_s0  ;;  %p2057_p11 = scmp.lt.s32.totalorder %s2053_s2, %s2328_s24 }
0x26a6   :  { %p2058_p12 = scmp.lt.s32.totalorder %s2056_s5, %s2054_s0 }
0x26a8   :  { %p2059_p13 = por %p2058_p12, %p2057_p11 }
0x26aa   :  { %p2060_p0 = pnand %p2059_p13, %p2055_p10 }
0x26ac   :  { %2063 = shalt.err (!%p2060_p0)
}
0x26ad   :  { %1733 = dma.vmem_to_hbm [thread:$0]  %s1729_s1, 64, %s1731_s4, [#allocation8]  }
0x26ae   :  { %s2177_s13 = smov [#allocation10]   ;;  %s1741_s21 = sshll.u32 %s2333_s19, 4  ;;  %s1742_s21 = int_to_ptr.hbm [resolvable:$true] %s1741_s21 }
0x26af   :  { %s1739_s17 = sshll.u32 %s2177_s13, 4  ;;  %s2076_s25 = sshra.s32 %s1742_s21, 4  ;;  %s1740_s17 = int_to_ptr.vmem [resolvable:$true] %s1739_s17  ;;  %s2077_s25 = int_to_ptr.hbm [resolvable:$true] %s2076_s25 }
0x26b0   :  { %s2078_s29 = scalar_lea.hbm %s2077_s25, 4  ;;  %s2080_s3 = scalar_lea.hbm %s2333_s19, 4 }
0x26b1   :  { %p2079_p1 = scmp.ne.s32.totalorder %s2077_s25, %s2078_s29  ;;  %p2081_p2 = scmp.lt.s32.totalorder %s2077_s25, %s2333_s19 }
0x26b2   :  { %p2082_p3 = scmp.lt.s32.totalorder %s2080_s3, %s2078_s29 }
0x26b4   :  { %p2083_p4 = por %p2082_p3, %p2081_p2 }
0x26b6   :  { %p2084_p5 = pnand %p2083_p4, %p2079_p1 }
0x26b8   :  { %2087 = shalt.err (!%p2084_p5)
}
0x26b9   :  { %1744 = dma.vmem_to_hbm [thread:$0]  %s1740_s17, 64, %s1742_s21, [#allocation11]  }
0x26ba   :  { %s2757_s24 = sld [smem:[#allocation27_spill]]  ;;  %s2178_s8 = smov [#allocation4]  }
0x26bb   :  { %s1695_s14 = sshll.u32 %s2178_s8, 4  ;;  %s2179_s6 = smov [#allocation6]   ;;  %s1696_s14 = int_to_ptr.vmem [resolvable:$true] %s1695_s14 }
0x26bc   :  { %s2718_s12 = sshll.u32 %s2179_s6, 4  ;;  %s1708_s19 = sshll.u32 %s2318_s9, 4  ;;  %s1707_s12 = int_to_ptr.vmem [resolvable:$true] %s2718_s12  ;;  %s1709_s19 = int_to_ptr.hbm [resolvable:$true] %s1708_s19 }
0x26c0   :  { %s1697_s30 = sshll.u32 %s2757_s24, 4  ;;  %s2104_s7 = scalar_lea.hbm %s2757_s24, 4  ;;  %s1698_s30 = int_to_ptr.hbm [resolvable:$true] %s1697_s30 }
0x26c1   :  { %s2100_s20 = sshra.s32 %s1698_s30, 4  ;;  %s2101_s20 = int_to_ptr.hbm [resolvable:$true] %s2100_s20 }
0x26c2   :  { %s2102_s27 = scalar_lea.hbm %s2101_s20, 4  ;;  %p2105_p7 = scmp.lt.s32.totalorder %s2101_s20, %s2757_s24 }
0x26c3   :  { %p2103_p6 = scmp.ne.s32.totalorder %s2101_s20, %s2102_s27  ;;  %p2106_p8 = scmp.lt.s32.totalorder %s2104_s7, %s2102_s27 }
0x26c5   :  { %p2107_p9 = por %p2106_p8, %p2105_p7 }
0x26c7   :  { %p2108_p10 = pnand %p2107_p9, %p2103_p6 }
0x270b   :  { %v1667_v23 = vpop.f32.mrf.mxu1 }
0x270c   :  { %v1675_v28 = vadd.f32 %v2698_v53, %v1667_v23 }
0x270e   :  { %v1676_v0 = vmul.f32 0.041666668, %v1675_v28 }
0x2710   :  { %v1677_v1 = vadd.f32 %v1676_v0, %v2679_v8 }
0x2712   :  { %1678 = vst.msk [vmem:[#allocation4] sm:$0xf] %vm181_vm3, %v1677_v1 }
0x2713   :  { %v1669_v3 = vpop.f32.mrf.mxu1 }
0x2714   :  { %2111 = shalt.err (!%p2108_p10)
}
0x2715   :  { %1700 = dma.vmem_to_hbm [thread:$0]  %s1696_s14, 64, %s1698_s30, [#allocation5]  }
0x2716   :  { %s2124_s10 = sshra.s32 %s1709_s19, 4  ;;  %s2128_s15 = scalar_lea.hbm %s2318_s9, 4  ;;  %s2125_s10 = int_to_ptr.hbm [resolvable:$true] %s2124_s10 }
0x2717   :  { %s2126_s11 = scalar_lea.hbm %s2125_s10, 4  ;;  %p2129_p12 = scmp.lt.s32.totalorder %s2125_s10, %s2318_s9 }
0x2718   :  { %p2127_p11 = scmp.ne.s32.totalorder %s2125_s10, %s2126_s11  ;;  %p2130_p13 = scmp.lt.s32.totalorder %s2128_s15, %s2126_s11 }
0x271a   :  { %p2131_p0 = por %p2130_p13, %p2129_p12 }
0x271c   :  { %p2132_p1 = pnand %p2131_p0, %p2127_p11 }
0x271e   :  { %2135 = shalt.err (!%p2132_p1)
}
0x271f   :  { %1711 = dma.vmem_to_hbm [thread:$0]  %s1707_s12, 64, %s1709_s19, [#allocation5]  }
0x2720   :  { %2136 = dma.done.wait [#allocation3], 64  }
0x2721   :  { %2137 = vsyncadd [#allocation3], 4294967232 }
0x2722   :  { %2138 = dma.done.wait [#allocation5], 128  }
0x2723   :  { %2139 = vsyncadd [#allocation5], 4294967168 }
0x2724   :  { %2140 = dma.done.wait [#allocation8], 128  }
0x2725   :  { %2141 = vsyncadd [#allocation8], 4294967168 }
0x2726   :  { %2142 = dma.done.wait [#allocation11], 64  }
0x2727   :  { %2143 = vsyncadd [#allocation11], 4294967232 }
0x2728   :  { %1769 = vsyncpa [#allocation3], 1 }
0x2729   :  { %1770 = vsyncpa [#allocation5], 1 }
0x272a   :  { %1771 = vsyncpa [#allocation8], 1 }
0x272b   :  { %1772 = vsyncpa [#allocation11], 1 }

</bundles_post_ra>
